<compile_context>
chip_gen: v5e
topology: v5e:2x2
jax: 0.10.0
libtpu: 0.0.40
codegen_flags: <defaults>
</compile_context>

<pallas_src>
import functools

import jax
import jax.numpy as jnp
from jax import lax
from jax.experimental import pallas as pl
from jax.experimental.pallas import tpu as pltpu


# ----------------------------------------------------------------------------
# Fused Pallas kernel: all GIN layers + virtual-node updates + sum pooling
# grid = (layer, node_row_tile), both 'arbitrary' (carried VMEM state).
# ----------------------------------------------------------------------------
def _fused_gnn_kernel(eps_ref, adj_ref, seg_ref, h0_ref,
                      cw1_ref, cb1_ref, cw2_ref, cb2_ref,
                      vw1_ref, vb1_ref, vw2_ref, vb2_ref,
                      hg_ref,
                      h_scr, hcur_scr, vn_scr,
                      *, num_layers, num_tiles, tile_n):
    layer = pl.program_id(0)                     # GNN layer (weights streamed per l)
    tile = pl.program_id(1)                      # node-row tile of this layer
    row0 = pl.multiple_of(tile * tile_n, tile_n)
    is_last_layer = layer == num_layers - 1

    # ---- grid start: load encoder features, zero the virtual-node state ----
    @pl.when(jnp.logical_and(layer == 0, tile == 0))
    def _():
        h_scr[...] = h0_ref[...]
        vn_scr[...] = jnp.zeros_like(vn_scr)

    # ---- layer start (first row tile) ---------------------------------------
    # h_cur = h + vn[batch_id]  (== S^T @ vn, done via dot_general so S^T is
    # never materialized), and the virtual-node MLP update for this layer
    # (it only depends on h_cur, so it is hoisted here).
    @pl.when(tile == 0)
    def _():
        seg = seg_ref[...]                                        # bf16 [B_PAD, N_PAD]
        vn_bcast = lax.dot_general(
            seg, vn_scr[...].astype(jnp.bfloat16),
            dimension_numbers=(((0,), (0,)), ((), ())),
            preferred_element_type=jnp.float32)                   # [N_PAD, H]
        h_cur = (h_scr[...].astype(jnp.float32) + vn_bcast).astype(jnp.bfloat16)
        hcur_scr[...] = h_cur

        @pl.when(jnp.logical_not(is_last_layer))
        def _():
            # vn <- relu(bnfold(relu(bnfold((S @ h_cur + vn) @ Vw1 + vb1)) @ Vw2 + vb2))
            pooled = (jnp.dot(seg, h_cur, preferred_element_type=jnp.float32)
                      + vn_scr[...])
            u = jnp.maximum(
                jnp.dot(pooled.astype(jnp.bfloat16), vw1_ref[...],
                        preferred_element_type=jnp.float32) + vb1_ref[...], 0.0)
            vn_scr[...] = jnp.maximum(
                jnp.dot(u.astype(jnp.bfloat16), vw2_ref[...],
                        preferred_element_type=jnp.float32) + vb2_ref[...], 0.0)

    # ---- GIN conv for this node-row tile ------------------------------------
    # agg = A[tile, :] @ relu(h_cur)  (adjacency rows streamed per grid step)
    h_cur_t = hcur_scr[pl.ds(row0, tile_n), :]                    # bf16 [tile_n, H]
    agg = jnp.dot(adj_ref[...], jnp.maximum(hcur_scr[...], 0.0),
                  preferred_element_type=jnp.float32)             # [tile_n, H] f32
    y = (1.0 + eps_ref[...]) * h_cur_t.astype(jnp.float32) + agg
    # mlp: Linear -> BN -> ReLU -> Linear, then outer batch_norms[layer]
    # (both BNs pre-folded into cw1/cb1 and cw2/cb2).
    h1 = jnp.maximum(
        jnp.dot(y.astype(jnp.bfloat16), cw1_ref[...],
                preferred_element_type=jnp.float32) + cb1_ref[...], 0.0)
    h2 = (jnp.dot(h1.astype(jnp.bfloat16), cw2_ref[...],
                  preferred_element_type=jnp.float32) + cb2_ref[...])
    # ReLU on every layer but the last; dropout(p=0) is the identity.
    h2 = jnp.where(is_last_layer, h2, jnp.maximum(h2, 0.0))
    h_scr[pl.ds(row0, tile_n), :] = h2.astype(jnp.bfloat16)

    # ---- last grid step: JK='last' node repr complete -> graph sum pooling --
    @pl.when(jnp.logical_and(is_last_layer, tile == num_tiles - 1))
    def _():
        hg_ref[...] = jnp.dot(seg_ref[...], h_scr[...],
                              preferred_element_type=jnp.float32)


def fused_gnn_forward(adj_pad, seg_pad, h0, folded, *, tile_n=128):
    num_layers = folded['cw1'].shape[0]
    n_pad, hdim = h0.shape
    b_pad = seg_pad.shape[0]
    assert n_pad % tile_n == 0 and tile_n % 128 == 0
    assert hdim % 128 == 0 and b_pad % 8 == 0
    num_tiles = n_pad // tile_n

    def per_layer(*trailing):
        # stream one layer's slab per grid step; leading layer dim is squeezed
        return pl.BlockSpec((None,) + trailing,
                            lambda l, t: (l,) + (0,) * len(trailing))

    in_specs = [
        per_layer(1, 1),                                       # eps   [L,1,1]  f32
        pl.BlockSpec((tile_n, n_pad), lambda l, t: (t, 0)),    # adj row tile   bf16
        pl.BlockSpec((b_pad, n_pad), lambda l, t: (0, 0)),     # seg (resident) bf16
        pl.BlockSpec((n_pad, hdim), lambda l, t: (0, 0)),      # h0  (resident) bf16
        per_layer(hdim, hdim), per_layer(1, hdim),             # cw1 bf16, cb1 f32
        per_layer(hdim, hdim), per_layer(1, hdim),             # cw2 bf16, cb2 f32
        per_layer(hdim, hdim), per_layer(1, hdim),             # vw1 bf16, vb1 f32
        per_layer(hdim, hdim), per_layer(1, hdim),             # vw2 bf16, vb2 f32
    ]

    # Advisory cost estimate for XLA scheduling around the custom call.
    conv_flops = num_tiles * (2 * tile_n * n_pad * hdim + 4 * tile_n * hdim * hdim)
    flops = 0
    for l in range(num_layers):
        flops += 2 * n_pad * b_pad * hdim + conv_flops          # vn broadcast + conv
        if l < num_layers - 1:
            flops += 2 * b_pad * n_pad * hdim + 4 * b_pad * hdim * hdim
    flops += 2 * b_pad * n_pad * hdim                           # final pooling
    weight_bytes = sum(int(folded[k].size) * folded[k].dtype.itemsize
                       for k in ('eps', 'cw1', 'cb1', 'cw2', 'cb2',
                                 'vw1', 'vb1', 'vw2', 'vb2'))
    bytes_accessed = (num_layers * int(adj_pad.size) * adj_pad.dtype.itemsize
                      + int(seg_pad.size) * seg_pad.dtype.itemsize
                      + int(h0.size) * h0.dtype.itemsize
                      + weight_bytes + b_pad * hdim * 4)

    return pl.pallas_call(
        functools.partial(_fused_gnn_kernel, num_layers=num_layers,
                          num_tiles=num_tiles, tile_n=tile_n),
        grid=(num_layers, num_tiles),
        in_specs=in_specs,
        out_specs=pl.BlockSpec((b_pad, hdim), lambda l, t: (0, 0)),
        out_shape=jax.ShapeDtypeStruct((b_pad, hdim), jnp.float32),
        scratch_shapes=[
            pltpu.VMEM((n_pad, hdim), jnp.bfloat16),   # h      (layer outputs)
            pltpu.VMEM((n_pad, hdim), jnp.bfloat16),   # h_cur  (h + vn broadcast)
            pltpu.VMEM((b_pad, hdim), jnp.float32),    # virtual-node state
        ],
        compiler_params=pltpu.CompilerParams(
            # Both axes carry VMEM state (h/vn across layers, h_cur within a
            # layer) so neither may be core-sharded -> 'arbitrary'.
            dimension_semantics=("arbitrary", "arbitrary"),
            # Tiny at these test shapes; at real sizes budget per generation
            # (v5e/v6e: up to ~100 MiB, v7x: <= ~48 MiB of its 64 MiB VMEM).
            vmem_limit_bytes=32 * 1024 * 1024),
        cost_estimate=pl.CostEstimate(flops=flops, transcendentals=0,
                                      bytes_accessed=bytes_accessed),
    )(folded['eps'], adj_pad, seg_pad, h0,
      folded['cw1'], folded['cb1'], folded['cw2'], folded['cb2'],
      folded['vw1'], folded['vb1'], folded['vw2'], folded['vb2'])


# ----------------------------------------------------------------------------
# Parameter init (deterministic, synthetic) and BN folding
# ----------------------------------------------------------------------------
def init_params(key, H, L, target_dim, num_nodetypes, num_nodeattr, max_depth):
    keys = iter(jax.random.split(key, 256))

    def nrm(shape, scale=0.1):
        return (scale * jax.random.normal(next(keys), shape)).astype(jnp.float32)

    def bn_fold():
        gamma = 1.0 + nrm((H,), 0.05)
        beta = nrm((H,), 0.05)
        mean = nrm((H,), 0.05)
        var = 1.0 + 0.1 * jnp.abs(jax.random.normal(next(keys), (H,)))
        scale = gamma / jnp.sqrt(var + 1e-5)
        shift = beta - mean * scale
        return (scale.reshape(1, H).astype(jnp.float32),
                shift.reshape(1, H).astype(jnp.float32))

    params = {
        'type_emb': nrm((num_nodetypes, H)),
        'attr_emb': nrm((num_nodeattr, H)),
        'depth_emb': nrm((max_depth + 1, H)),
    }
    convs = []
    for _ in range(L):
        s1, t1 = bn_fold()          # mlp-internal BN
        s2, t2 = bn_fold()          # outer batch_norms[layer]
        convs.append(dict(eps=jnp.zeros((1,), jnp.float32),   # nn.Parameter([0])
                          w1=nrm((H, H)), b1=nrm((1, H)), s1=s1, t1=t1,
                          w2=nrm((H, H)), b2=nrm((1, H)), s2=s2, t2=t2))
    params['conv'] = convs
    vns = []
    for _ in range(L - 1):
        s1, t1 = bn_fold()
        s2, t2 = bn_fold()
        vns.append(dict(w1=nrm((H, H)), b1=nrm((1, H)), s1=s1, t1=t1,
                        w2=nrm((H, H)), b2=nrm((1, H)), s2=s2, t2=t2))
    params['vn'] = vns
    params['wp'] = nrm((H, target_dim))
    params['bp'] = nrm((1, target_dim))
    return params


def fold_params(params):
    """Fold eval-mode BN into the Linear weights, stack layers, cast to bf16."""
    L = len(params['conv'])

    def fold(w, b, s, t):
        # (x @ w + b) * s + t  ==  x @ (w * s) + (b * s + t)
        return w * s, b * s + t

    def pad_to_L(x):                    # pad the vn stacks (L-1 layers) to L
        if x.shape[0] == L:
            return x
        pad = jnp.zeros((L - x.shape[0],) + x.shape[1:], x.dtype)
        return jnp.concatenate([x, pad], axis=0)

    cw1, cb1, cw2, cb2 = [], [], [], []
    for p in params['conv']:
        w1f, b1f = fold(p['w1'], p['b1'], p['s1'], p['t1'])
        w2f, b2f = fold(p['w2'], p['b2'], p['s2'], p['t2'])
        cw1.append(w1f); cb1.append(b1f); cw2.append(w2f); cb2.append(b2f)
    vw1, vb1, vw2, vb2 = [], [], [], []
    for q in params['vn']:
        w1f, b1f = fold(q['w1'], q['b1'], q['s1'], q['t1'])
        w2f, b2f = fold(q['w2'], q['b2'], q['s2'], q['t2'])
        vw1.append(w1f); vb1.append(b1f); vw2.append(w2f); vb2.append(b2f)

    bf = jnp.bfloat16
    return dict(
        eps=jnp.stack([p['eps'] for p in params['conv']]
                      ).reshape(L, 1, 1).astype(jnp.float32),
        cw1=jnp.stack(cw1).astype(bf), cb1=jnp.stack(cb1).reshape(L, 1, -1),
        cw2=jnp.stack(cw2).astype(bf), cb2=jnp.stack(cb2).reshape(L, 1, -1),
        vw1=pad_to_L(jnp.stack(vw1).astype(bf)),
        vb1=pad_to_L(jnp.stack(vb1).reshape(L - 1, 1, -1)),
        vw2=pad_to_L(jnp.stack(vw2).astype(bf)),
        vb2=pad_to_L(jnp.stack(vb2).reshape(L - 1, 1, -1)))


# ----------------------------------------------------------------------------
# Forward (Pallas path)
# ----------------------------------------------------------------------------
def forward_pallas(params, folded, adj_pad, seg_pad, x_idx, depth,
                   *, N, N_PAD, B, max_depth, tile_n):
    H = params['type_emb'].shape[1]
    # ASTNodeEncoder: type_emb[x[:,0]] + attr_emb[x[:,1]] + depth_emb[min(depth, max)]
    d = jnp.minimum(depth, max_depth)
    h0 = (params['type_emb'][x_idx[:, 0]]
          + params['attr_emb'][x_idx[:, 1]]
          + params['depth_emb'][d])
    h0_pad = jnp.zeros((N_PAD, H), jnp.bfloat16).at[:N].set(h0.astype(jnp.bfloat16))

    h_graph = fused_gnn_forward(adj_pad, seg_pad, h0_pad, folded, tile_n=tile_n)

    # graph_pred_linear (target_dim=1): plain JAX to avoid a masked-store kernel.
    return h_graph[:B] @ params['wp'] + params['bp']


# ----------------------------------------------------------------------------
# Pure-JAX reference (unpadded, f32, unfolded BN) for verification
# ----------------------------------------------------------------------------
def forward_reference(params, adj, seg, batch_id, x_idx, depth, *, L, B, max_depth):
    d = jnp.minimum(depth, max_depth)
    h = (params['type_emb'][x_idx[:, 0]]
         + params['attr_emb'][x_idx[:, 1]]
         + params['depth_emb'][d])
    H = h.shape[1]
    vn = jnp.zeros((B, H), jnp.float32)
    h_list = [h]
    for layer in range(L):
        h_cur = h_list[layer] + vn[batch_id]
        h_list[layer] = h_cur
        p = params['conv'][layer]
        agg = adj @ jnp.maximum(h_cur, 0.0)
        y = (1.0 + p['eps'][0]) * h_cur + agg
        h1 = jnp.maximum((y @ p['w1'] + p['b1']) * p['s1'] + p['t1'], 0.0)
        h2 = (h1 @ p['w2'] + p['b2']) * p['s2'] + p['t2']
        if layer != L - 1:
            h2 = jnp.maximum(h2, 0.0)
        h_list.append(h2)
        if layer < L - 1:
            q = params['vn'][layer]
            t = seg @ h_cur + vn
            t = jnp.maximum((t @ q['w1'] + q['b1']) * q['s1'] + q['t1'], 0.0)
            t = jnp.maximum((t @ q['w2'] + q['b2']) * q['s2'] + q['t2'], 0.0)
            vn = t
    h_graph = seg @ h_list[-1]
    return h_graph @ params['wp'] + params['bp']


# ----------------------------------------------------------------------------
# Main
# ----------------------------------------------------------------------------
if __name__ == "__main__":
    H = 128            # hidden_dim (lane-dense)
    L = 5              # num_layers (module default)
    TARGET = 1
    NUM_NODETYPES, NUM_NODEATTR, MAX_DEPTH = 8, 16, 20

    # Batched graph: graph0 has nodes 0..6, graph1 has nodes 7..11.
    n_nodes = [7, 5]
    N = sum(n_nodes)          # 12 real nodes
    TILE_N = 128              # node-row tile (MXU-sized)
    N_PAD = 256               # 2 row tiles -> exercises the tiled grid
    B = 2
    B_PAD = 8

    edges = [(0, 1), (1, 2), (2, 3), (3, 0), (4, 5), (5, 6), (6, 4), (1, 4),
             (7, 8), (8, 9), (9, 10), (10, 11), (11, 7), (8, 10)]

    adj = jnp.zeros((N, N), jnp.float32)
    for (u, v) in edges:                      # message u -> v, aggregated at v
        adj = adj.at[v, u].add(1.0)
    adj_pad = jnp.zeros((N_PAD, N_PAD), jnp.bfloat16).at[:N, :N].set(
        adj.astype(jnp.bfloat16))

    batch_id = jnp.array([0] * n_nodes[0] + [1] * n_nodes[1], jnp.int32)
    seg = jnp.zeros((B, N), jnp.float32).at[batch_id, jnp.arange(N)].set(1.0)
    seg_pad = jnp.zeros((B_PAD, N_PAD), jnp.bfloat16).at[:B, :N].set(
        seg.astype(jnp.bfloat16))

    # Correctness invariant: padded node columns/rows of adj and seg must stay
    # zero, otherwise padded nodes (which acquire relu(bias) features after
    # layer 1) would pollute real rows / graph sums.
    assert bool(jnp.all(adj_pad[:, N:] == 0)) and bool(jnp.all(adj_pad[N:, :] == 0))
    assert bool(jnp.all(seg_pad[:, N:] == 0)) and bool(jnp.all(seg_pad[B:, :] == 0))

    key = jax.random.PRNGKey(0)
    k_feat, k_depth, k_par = jax.random.split(key, 3)
    x_idx = jnp.stack(
        [jax.random.randint(k_feat, (N,), 0, NUM_NODETYPES),
         jax.random.randint(jax.random.fold_in(k_feat, 1), (N,), 0, NUM_NODEATTR)],
        axis=1).astype(jnp.int32)
    depth = jax.random.randint(k_depth, (N,), 0, 6).astype(jnp.int32)

    params = init_params(k_par, H, L, TARGET, NUM_NODETYPES, NUM_NODEATTR,
                         MAX_DEPTH)
    folded = fold_params(params)

    out = forward_pallas(params, folded, adj_pad, seg_pad, x_idx, depth,
                         N=N, N_PAD=N_PAD, B=B, max_depth=MAX_DEPTH,
                         tile_n=TILE_N)
    out = jax.block_until_ready(out)

    ref = forward_reference(params, adj, seg, batch_id, x_idx, depth,
                            L=L, B=B, max_depth=MAX_DEPTH)
    assert out.shape == (B, TARGET)
    # bf16 operands (f32 accumulation) -> allow a few % of the output scale.
    err = float(jnp.max(jnp.abs(out - ref)))
    scale = float(jnp.max(jnp.abs(ref)))
    assert err <= 5e-2 * scale + 5e-2, (err, scale, out, ref)

    print("KERNEL_OK")
</pallas_src>

<mosaic_0001>
module attributes {stable_mosaic.version = 11 : i64} {
  func.func @_fused_gnn_kernel(%arg0: i32, %arg1: i32, %arg2: memref<1x1x1xf32, #tpu.memory_space<vmem>>, %arg3: memref<128x256xbf16, #tpu.memory_space<vmem>>, %arg4: memref<8x256xbf16, #tpu.memory_space<vmem>>, %arg5: memref<256x128xbf16, #tpu.memory_space<vmem>>, %arg6: memref<1x128x128xbf16, #tpu.memory_space<vmem>>, %arg7: memref<1x1x128xf32, #tpu.memory_space<vmem>>, %arg8: memref<1x128x128xbf16, #tpu.memory_space<vmem>>, %arg9: memref<1x1x128xf32, #tpu.memory_space<vmem>>, %arg10: memref<1x128x128xbf16, #tpu.memory_space<vmem>>, %arg11: memref<1x1x128xf32, #tpu.memory_space<vmem>>, %arg12: memref<1x128x128xbf16, #tpu.memory_space<vmem>>, %arg13: memref<1x1x128xf32, #tpu.memory_space<vmem>>, %arg14: memref<8x128xf32, #tpu.memory_space<vmem>>, %arg15: memref<256x128xbf16, #tpu.memory_space<vmem>>, %arg16: memref<256x128xbf16, #tpu.memory_space<vmem>>, %arg17: memref<8x128xf32, #tpu.memory_space<vmem>>) attributes {dimension_semantics = [#tpu.dimension_semantics<arbitrary>, #tpu.dimension_semantics<arbitrary>], iteration_bounds = array<i64: 5, 2>, scalar_prefetch = 0 : i64, scratch_operands = 3 : i64, tpu.core_type = #tpu.core_type<tc>, window_params = [{transform_indices = @transform_0, window_bounds = array<i64: 1, 1, 1>}, {transform_indices = @transform_1, window_bounds = array<i64: 128, 256>}, {pipeline_mode = #tpu.pipeline_mode<synchronous>, transform_indices = @transform_2, window_bounds = array<i64: 8, 256>}, {pipeline_mode = #tpu.pipeline_mode<synchronous>, transform_indices = @transform_3, window_bounds = array<i64: 256, 128>}, {transform_indices = @transform_4, window_bounds = array<i64: 1, 128, 128>}, {transform_indices = @transform_5, window_bounds = array<i64: 1, 1, 128>}, {transform_indices = @transform_6, window_bounds = array<i64: 1, 128, 128>}, {transform_indices = @transform_7, window_bounds = array<i64: 1, 1, 128>}, {transform_indices = @transform_8, window_bounds = array<i64: 1, 128, 128>}, {transform_indices = @transform_9, window_bounds = array<i64: 1, 1, 128>}, {transform_indices = @transform_10, window_bounds = array<i64: 1, 128, 128>}, {transform_indices = @transform_11, window_bounds = array<i64: 1, 1, 128>}, {pipeline_mode = #tpu.pipeline_mode<synchronous>, transform_indices = @transform_12, window_bounds = array<i64: 8, 128>}]} {
    %c128_i32 = arith.constant 128 : i32
    %0 = arith.muli %arg1, %c128_i32 : i32
    %1 = tpu.assume_multiple %0, 128 : i32
    %c4_i32 = arith.constant 4 : i32
    %2 = arith.cmpi eq, %arg0, %c4_i32 : i32
    %c0_i32 = arith.constant 0 : i32
    %3 = arith.cmpi eq, %arg0, %c0_i32 : i32
    %c0_i32_0 = arith.constant 0 : i32
    %4 = arith.cmpi eq, %arg1, %c0_i32_0 : i32
    %5 = arith.andi %3, %4 : i1
    %6 = arith.extui %5 : i1 to i32
    %c0_i32_1 = arith.constant 0 : i32
    %7 = arith.cmpi ne, %6, %c0_i32_1 : i32
    scf.if %7 {
      %c0_31 = arith.constant 0 : index
      %c0_32 = arith.constant 0 : index
      %54 = vector.load %arg5[%c0_31, %c0_32] : memref<256x128xbf16, #tpu.memory_space<vmem>>, vector<256x128xbf16>
      %c0_33 = arith.constant 0 : index
      %c0_34 = arith.constant 0 : index
      %55 = vector.load %arg15[%c0_33, %c0_34] : memref<256x128xbf16, #tpu.memory_space<vmem>>, vector<256x128xbf16>
      tpu.vector_store %arg15[%c0_33, %c0_34], %54 {strides = array<i32>} : memref<256x128xbf16, #tpu.memory_space<vmem>>, vector<256x128xbf16>,
      %cst_35 = arith.constant 0.000000e+00 : f32
      %56 = vector.broadcast %cst_35 : f32 to vector<8x128xf32>
      %c0_36 = arith.constant 0 : index
      %c0_37 = arith.constant 0 : index
      %57 = vector.load %arg17[%c0_36, %c0_37] : memref<8x128xf32, #tpu.memory_space<vmem>>, vector<8x128xf32>
      tpu.vector_store %arg17[%c0_36, %c0_37], %56 {strides = array<i32>} : memref<8x128xf32, #tpu.memory_space<vmem>>, vector<8x128xf32>,
    } else {
    }
    %c0_i32_2 = arith.constant 0 : i32
    %8 = arith.cmpi eq, %arg1, %c0_i32_2 : i32
    %9 = arith.extui %8 : i1 to i32
    %c0_i32_3 = arith.constant 0 : i32
    %10 = arith.cmpi ne, %9, %c0_i32_3 : i32
    scf.if %10 {
      %c0_31 = arith.constant 0 : index
      %c0_32 = arith.constant 0 : index
      %54 = vector.load %arg4[%c0_31, %c0_32] : memref<8x256xbf16, #tpu.memory_space<vmem>>, vector<8x256xbf16>
      %c0_33 = arith.constant 0 : index
      %c0_34 = arith.constant 0 : index
      %55 = vector.load %arg17[%c0_33, %c0_34] : memref<8x128xf32, #tpu.memory_space<vmem>>, vector<8x128xf32>
      %56 = arith.truncf %55 : vector<8x128xf32> to vector<8x128xbf16>
      %cst_35 = arith.constant dense<0.000000e+00> : vector<256x128xf32>
      %57 = tpu.matmul %54, %56, %cst_35 {dimension_numbers = #tpu.dot_dimension_numbers<[0], [0], [1], [1], [0, 1, 1, 1], [], []>} : vector<8x256xbf16>, vector<8x128xbf16>, vector<256x128xf32> -> vector<256x128xf32>
      %c0_36 = arith.constant 0 : index
      %c0_37 = arith.constant 0 : index
      %58 = vector.load %arg15[%c0_36, %c0_37] : memref<256x128xbf16, #tpu.memory_space<vmem>>, vector<256x128xbf16>
      %59 = arith.extf %58 : vector<256x128xbf16> to vector<256x128xf32>
      %60 = arith.addf %59, %57 : vector<256x128xf32>
      %61 = arith.truncf %60 : vector<256x128xf32> to vector<256x128xbf16>
      %c0_38 = arith.constant 0 : index
      %c0_39 = arith.constant 0 : index
      %62 = vector.load %arg16[%c0_38, %c0_39] : memref<256x128xbf16, #tpu.memory_space<vmem>>, vector<256x128xbf16>
      tpu.vector_store %arg16[%c0_38, %c0_39], %61 {strides = array<i32>} : memref<256x128xbf16, #tpu.memory_space<vmem>>, vector<256x128xbf16>,
      %true = arith.constant true
      %63 = arith.xori %2, %true : i1
      %64 = arith.extui %63 : i1 to i32
      %c0_i32_40 = arith.constant 0 : i32
      %65 = arith.cmpi ne, %64, %c0_i32_40 : i32
      scf.if %65 {
        %cst_41 = arith.constant dense<0.000000e+00> : vector<8x128xf32>
        %66 = tpu.matmul %54, %61, %cst_41 {dimension_numbers = #tpu.dot_dimension_numbers<[1], [0], [0], [1], [0, 0, 1, 1], [], []>} : vector<8x256xbf16>, vector<256x128xbf16>, vector<8x128xf32> -> vector<8x128xf32>
        %c0_42 = arith.constant 0 : index
        %c0_43 = arith.constant 0 : index
        %67 = vector.load %arg17[%c0_42, %c0_43] : memref<8x128xf32, #tpu.memory_space<vmem>>, vector<8x128xf32>
        %68 = arith.addf %66, %67 : vector<8x128xf32>
        %69 = arith.truncf %68 : vector<8x128xf32> to vector<8x128xbf16>
        %c0_44 = arith.constant 0 : index
        %c0_45 = arith.constant 0 : index
        %c0_46 = arith.constant 0 : index
        %70 = vector.load %arg10[%c0_44, %c0_45, %c0_46] : memref<1x128x128xbf16, #tpu.memory_space<vmem>>, vector<1x128x128xbf16>
        %71 = vector.shape_cast %70 : vector<1x128x128xbf16> to vector<128x128xbf16>
        %cst_47 = arith.constant dense<0.000000e+00> : vector<8x128xf32>
        %72 = tpu.matmul %69, %71, %cst_47 {dimension_numbers = #tpu.dot_dimension_numbers<[1], [0], [0], [1], [0, 0, 1, 1], [], []>} : vector<8x128xbf16>, vector<128x128xbf16>, vector<8x128xf32> -> vector<8x128xf32>
        %c0_48 = arith.constant 0 : index
        %c0_49 = arith.constant 0 : index
        %c0_50 = arith.constant 0 : index
        %73 = vector.load %arg11[%c0_48, %c0_49, %c0_50] : memref<1x1x128xf32, #tpu.memory_space<vmem>>, vector<1x1x128xf32>
        %74 = vector.shape_cast %73 : vector<1x1x128xf32> to vector<1x128xf32>
        %75 = vector.broadcast %74 : vector<1x128xf32> to vector<8x128xf32>
        %76 = arith.addf %72, %75 : vector<8x128xf32>
        %cst_51 = arith.constant 0.000000e+00 : f32
        %77 = vector.broadcast %cst_51 : f32 to vector<8x128xf32>
        %78 = arith.maximumf %76, %77 : vector<8x128xf32>
        %79 = arith.truncf %78 : vector<8x128xf32> to vector<8x128xbf16>
        %c0_52 = arith.constant 0 : index
        %c0_53 = arith.constant 0 : index
        %c0_54 = arith.constant 0 : index
        %80 = vector.load %arg12[%c0_52, %c0_53, %c0_54] : memref<1x128x128xbf16, #tpu.memory_space<vmem>>, vector<1x128x128xbf16>
        %81 = vector.shape_cast %80 : vector<1x128x128xbf16> to vector<128x128xbf16>
        %cst_55 = arith.constant dense<0.000000e+00> : vector<8x128xf32>
        %82 = tpu.matmul %79, %81, %cst_55 {dimension_numbers = #tpu.dot_dimension_numbers<[1], [0], [0], [1], [0, 0, 1, 1], [], []>} : vector<8x128xbf16>, vector<128x128xbf16>, vector<8x128xf32> -> vector<8x128xf32>
        %c0_56 = arith.constant 0 : index
        %c0_57 = arith.constant 0 : index
        %c0_58 = arith.constant 0 : index
        %83 = vector.load %arg13[%c0_56, %c0_57, %c0_58] : memref<1x1x128xf32, #tpu.memory_space<vmem>>, vector<1x1x128xf32>
        %84 = vector.shape_cast %83 : vector<1x1x128xf32> to vector<1x128xf32>
        %85 = vector.broadcast %84 : vector<1x128xf32> to vector<8x128xf32>
        %86 = arith.addf %82, %85 : vector<8x128xf32>
        %cst_59 = arith.constant 0.000000e+00 : f32
        %87 = vector.broadcast %cst_59 : f32 to vector<8x128xf32>
        %88 = arith.maximumf %86, %87 : vector<8x128xf32>
        %c0_60 = arith.constant 0 : index
        %c0_61 = arith.constant 0 : index
        %89 = vector.load %arg17[%c0_60, %c0_61] : memref<8x128xf32, #tpu.memory_space<vmem>>, vector<8x128xf32>
        tpu.vector_store %arg17[%c0_60, %c0_61], %88 {strides = array<i32>} : memref<8x128xf32, #tpu.memory_space<vmem>>, vector<8x128xf32>,
      } else {
      }
    } else {
    }
    %11 = arith.index_cast %1 : i32 to index
    %c0 = arith.constant 0 : index
    %12 = vector.load %arg16[%11, %c0] : memref<256x128xbf16, #tpu.memory_space<vmem>>, vector<128x128xbf16>
    %c0_4 = arith.constant 0 : index
    %c0_5 = arith.constant 0 : index
    %13 = vector.load %arg3[%c0_4, %c0_5] : memref<128x256xbf16, #tpu.memory_space<vmem>>, vector<128x256xbf16>
    %c0_6 = arith.constant 0 : index
    %c0_7 = arith.constant 0 : index
    %14 = vector.load %arg16[%c0_6, %c0_7] : memref<256x128xbf16, #tpu.memory_space<vmem>>, vector<256x128xbf16>
    %cst = arith.constant 0.000000e+00 : bf16
    %15 = vector.broadcast %cst : bf16 to vector<256x128xbf16>
    %16 = arith.maximumf %14, %15 : vector<256x128xbf16>
    %cst_8 = arith.constant dense<0.000000e+00> : vector<128x128xf32>
    %17 = tpu.matmul %13, %16, %cst_8 {dimension_numbers = #tpu.dot_dimension_numbers<[1], [0], [0], [1], [0, 0, 1, 1], [], []>} : vector<128x256xbf16>, vector<256x128xbf16>, vector<128x128xf32> -> vector<128x128xf32>
    %c0_9 = arith.constant 0 : index
    %c0_10 = arith.constant 0 : index
    %c0_11 = arith.constant 0 : index
    %18 = vector.load %arg2[%c0_9, %c0_10, %c0_11] : memref<1x1x1xf32, #tpu.memory_space<vmem>>, vector<1x1x1xf32>
    %19 = vector.shape_cast %18 : vector<1x1x1xf32> to vector<1x1xf32>
    %cst_12 = arith.constant 1.000000e+00 : f32
    %20 = vector.broadcast %cst_12 : f32 to vector<1x1xf32>
    %21 = arith.addf %20, %19 : vector<1x1xf32>
    %22 = arith.extf %12 : vector<128x128xbf16> to vector<128x128xf32>
    %23 = vector.broadcast %21 : vector<1x1xf32> to vector<128x128xf32>
    %24 = arith.mulf %23, %22 : vector<128x128xf32>
    %25 = arith.addf %24, %17 : vector<128x128xf32>
    %26 = arith.truncf %25 : vector<128x128xf32> to vector<128x128xbf16>
    %c0_13 = arith.constant 0 : index
    %c0_14 = arith.constant 0 : index
    %c0_15 = arith.constant 0 : index
    %27 = vector.load %arg6[%c0_13, %c0_14, %c0_15] : memref<1x128x128xbf16, #tpu.memory_space<vmem>>, vector<1x128x128xbf16>
    %28 = vector.shape_cast %27 : vector<1x128x128xbf16> to vector<128x128xbf16>
    %cst_16 = arith.constant dense<0.000000e+00> : vector<128x128xf32>
    %29 = tpu.matmul %26, %28, %cst_16 {dimension_numbers = #tpu.dot_dimension_numbers<[1], [0], [0], [1], [0, 0, 1, 1], [], []>} : vector<128x128xbf16>, vector<128x128xbf16>, vector<128x128xf32> -> vector<128x128xf32>
    %c0_17 = arith.constant 0 : index
    %c0_18 = arith.constant 0 : index
    %c0_19 = arith.constant 0 : index
    %30 = vector.load %arg7[%c0_17, %c0_18, %c0_19] : memref<1x1x128xf32, #tpu.memory_space<vmem>>, vector<1x1x128xf32>
    %31 = vector.shape_cast %30 : vector<1x1x128xf32> to vector<1x128xf32>
    %32 = vector.broadcast %31 : vector<1x128xf32> to vector<128x128xf32>
    %33 = arith.addf %29, %32 : vector<128x128xf32>
    %cst_20 = arith.constant 0.000000e+00 : f32
    %34 = vector.broadcast %cst_20 : f32 to vector<128x128xf32>
    %35 = arith.maximumf %33, %34 : vector<128x128xf32>
    %36 = arith.truncf %35 : vector<128x128xf32> to vector<128x128xbf16>
    %c0_21 = arith.constant 0 : index
    %c0_22 = arith.constant 0 : index
    %c0_23 = arith.constant 0 : index
    %37 = vector.load %arg8[%c0_21, %c0_22, %c0_23] : memref<1x128x128xbf16, #tpu.memory_space<vmem>>, vector<1x128x128xbf16>
    %38 = vector.shape_cast %37 : vector<1x128x128xbf16> to vector<128x128xbf16>
    %cst_24 = arith.constant dense<0.000000e+00> : vector<128x128xf32>
    %39 = tpu.matmul %36, %38, %cst_24 {dimension_numbers = #tpu.dot_dimension_numbers<[1], [0], [0], [1], [0, 0, 1, 1], [], []>} : vector<128x128xbf16>, vector<128x128xbf16>, vector<128x128xf32> -> vector<128x128xf32>
    %c0_25 = arith.constant 0 : index
    %c0_26 = arith.constant 0 : index
    %c0_27 = arith.constant 0 : index
    %40 = vector.load %arg9[%c0_25, %c0_26, %c0_27] : memref<1x1x128xf32, #tpu.memory_space<vmem>>, vector<1x1x128xf32>
    %41 = vector.shape_cast %40 : vector<1x1x128xf32> to vector<1x128xf32>
    %42 = vector.broadcast %41 : vector<1x128xf32> to vector<128x128xf32>
    %43 = arith.addf %39, %42 : vector<128x128xf32>
    %cst_28 = arith.constant 0.000000e+00 : f32
    %44 = vector.broadcast %cst_28 : f32 to vector<128x128xf32>
    %45 = arith.maximumf %43, %44 : vector<128x128xf32>
    %46 = arith.select %2, %43, %45 : vector<128x128xf32>
    %47 = arith.truncf %46 : vector<128x128xf32> to vector<128x128xbf16>
    %48 = arith.index_cast %1 : i32 to index
    %c0_29 = arith.constant 0 : index
    %49 = vector.load %arg15[%48, %c0_29] : memref<256x128xbf16, #tpu.memory_space<vmem>>, vector<128x128xbf16>
    tpu.vector_store %arg15[%48, %c0_29], %47 {strides = array<i32>} : memref<256x128xbf16, #tpu.memory_space<vmem>>, vector<128x128xbf16>,
    %c1_i32 = arith.constant 1 : i32
    %50 = arith.cmpi eq, %arg1, %c1_i32 : i32
    %51 = arith.andi %2, %50 : i1
    %52 = arith.extui %51 : i1 to i32
    %c0_i32_30 = arith.constant 0 : i32
    %53 = arith.cmpi ne, %52, %c0_i32_30 : i32
    scf.if %53 {
      %c0_31 = arith.constant 0 : index
      %c0_32 = arith.constant 0 : index
      %54 = vector.load %arg4[%c0_31, %c0_32] : memref<8x256xbf16, #tpu.memory_space<vmem>>, vector<8x256xbf16>
      %c0_33 = arith.constant 0 : index
      %c0_34 = arith.constant 0 : index
      %55 = vector.load %arg15[%c0_33, %c0_34] : memref<256x128xbf16, #tpu.memory_space<vmem>>, vector<256x128xbf16>
      %cst_35 = arith.constant dense<0.000000e+00> : vector<8x128xf32>
      %56 = tpu.matmul %54, %55, %cst_35 {dimension_numbers = #tpu.dot_dimension_numbers<[1], [0], [0], [1], [0, 0, 1, 1], [], []>} : vector<8x256xbf16>, vector<256x128xbf16>, vector<8x128xf32> -> vector<8x128xf32>
      %c0_36 = arith.constant 0 : index
      %c0_37 = arith.constant 0 : index
      %57 = vector.load %arg14[%c0_36, %c0_37] : memref<8x128xf32, #tpu.memory_space<vmem>>, vector<8x128xf32>
      tpu.vector_store %arg14[%c0_36, %c0_37], %56 {strides = array<i32>} : memref<8x128xf32, #tpu.memory_space<vmem>>, vector<8x128xf32>,
    } else {
    }
    return
  }
  func.func @transform_0(%arg0: i32, %arg1: i32) -> (i32, i32, i32) {
    %c0_i32 = arith.constant 0 : i32
    %c0_i32_0 = arith.constant 0 : i32
    %c0_i32_1 = arith.constant 0 : i32
    return %arg0, %c0_i32, %c0_i32_0 : i32, i32, i32
  }
  func.func @transform_1(%arg0: i32, %arg1: i32) -> (i32, i32) {
    %c0_i32 = arith.constant 0 : i32
    %c0_i32_0 = arith.constant 0 : i32
    return %arg1, %c0_i32 : i32, i32
  }
  func.func @transform_2(%arg0: i32, %arg1: i32) -> (i32, i32) {
    %c0_i32 = arith.constant 0 : i32
    %c0_i32_0 = arith.constant 0 : i32
    %c0_i32_1 = arith.constant 0 : i32
    return %c0_i32, %c0_i32_0 : i32, i32
  }
  func.func @transform_3(%arg0: i32, %arg1: i32) -> (i32, i32) {
    %c0_i32 = arith.constant 0 : i32
    %c0_i32_0 = arith.constant 0 : i32
    %c0_i32_1 = arith.constant 0 : i32
    return %c0_i32, %c0_i32_0 : i32, i32
  }
  func.func @transform_4(%arg0: i32, %arg1: i32) -> (i32, i32, i32) {
    %c0_i32 = arith.constant 0 : i32
    %c0_i32_0 = arith.constant 0 : i32
    %c0_i32_1 = arith.constant 0 : i32
    return %arg0, %c0_i32, %c0_i32_0 : i32, i32, i32
  }
  func.func @transform_5(%arg0: i32, %arg1: i32) -> (i32, i32, i32) {
    %c0_i32 = arith.constant 0 : i32
    %c0_i32_0 = arith.constant 0 : i32
    %c0_i32_1 = arith.constant 0 : i32
    return %arg0, %c0_i32, %c0_i32_0 : i32, i32, i32
  }
  func.func @transform_6(%arg0: i32, %arg1: i32) -> (i32, i32, i32) {
    %c0_i32 = arith.constant 0 : i32
    %c0_i32_0 = arith.constant 0 : i32
    %c0_i32_1 = arith.constant 0 : i32
    return %arg0, %c0_i32, %c0_i32_0 : i32, i32, i32
  }
  func.func @transform_7(%arg0: i32, %arg1: i32) -> (i32, i32, i32) {
    %c0_i32 = arith.constant 0 : i32
    %c0_i32_0 = arith.constant 0 : i32
    %c0_i32_1 = arith.constant 0 : i32
    return %arg0, %c0_i32, %c0_i32_0 : i32, i32, i32
  }
  func.func @transform_8(%arg0: i32, %arg1: i32) -> (i32, i32, i32) {
    %c0_i32 = arith.constant 0 : i32
    %c0_i32_0 = arith.constant 0 : i32
    %c0_i32_1 = arith.constant 0 : i32
    return %arg0, %c0_i32, %c0_i32_0 : i32, i32, i32
  }
  func.func @transform_9(%arg0: i32, %arg1: i32) -> (i32, i32, i32) {
    %c0_i32 = arith.constant 0 : i32
    %c0_i32_0 = arith.constant 0 : i32
    %c0_i32_1 = arith.constant 0 : i32
    return %arg0, %c0_i32, %c0_i32_0 : i32, i32, i32
  }
  func.func @transform_10(%arg0: i32, %arg1: i32) -> (i32, i32, i32) {
    %c0_i32 = arith.constant 0 : i32
    %c0_i32_0 = arith.constant 0 : i32
    %c0_i32_1 = arith.constant 0 : i32
    return %arg0, %c0_i32, %c0_i32_0 : i32, i32, i32
  }
  func.func @transform_11(%arg0: i32, %arg1: i32) -> (i32, i32, i32) {
    %c0_i32 = arith.constant 0 : i32
    %c0_i32_0 = arith.constant 0 : i32
    %c0_i32_1 = arith.constant 0 : i32
    return %arg0, %c0_i32, %c0_i32_0 : i32, i32, i32
  }
  func.func @transform_12(%arg0: i32, %arg1: i32) -> (i32, i32) {
    %c0_i32 = arith.constant 0 : i32
    %c0_i32_0 = arith.constant 0 : i32
    %c0_i32_1 = arith.constant 0 : i32
    return %c0_i32, %c0_i32_0 : i32, i32
  }
}

</mosaic_0001>

<bundles_post_ra>
// kernel: tpu_custom_call.1
= control target key start
LH: loop header
LB: loop body
LE: loop exit
PB: predicated region body
PF: predicated region fallthrough
CT: control target
= control target key end

     0   :  { %s4635_s0 = inlined_call_operand.vmem [shape: f32[5,1,1], index: 0, kind: input, shape index: {}]   ;;  %s4636_s1 = inlined_call_operand.hbm [shape: bf16[256,256], index: 1, kind: input, shape index: {}]   ;;  %s4637_s2 = inlined_call_operand.hbm [shape: bf16[8,256], index: 2, kind: input, shape index: {}]   ;;  %s4638_s3 = inlined_call_operand.hbm [shape: bf16[256,128], index: 3, kind: input, shape index: {}]   ;;  %s4639_s4 = inlined_call_operand.hbm [shape: bf16[5,128,128], index: 4, kind: input, shape index: {}]   ;;  %s4640_s5 = inlined_call_operand.vmem [shape: f32[5,1,128], index: 5, kind: input, shape index: {}]   ;;  %s4641_s6 = inlined_call_operand.hbm [shape: bf16[5,128,128], index: 6, kind: input, shape index: {}]   ;;  %s4642_s7 = inlined_call_operand.vmem [shape: f32[5,1,128], index: 7, kind: input, shape index: {}]   ;;  %s4643_s8 = inlined_call_operand.hbm [shape: bf16[5,128,128], index: 8, kind: input, shape index: {}]   ;;  %s4644_s9 = inlined_call_operand.hbm [shape: f32[5,1,128], index: 9, kind: input, shape index: {}]   ;;  %s4645_s10 = inlined_call_operand.hbm [shape: bf16[5,128,128], index: 10, kind: input, shape index: {}]   ;;  %s4646_s11 = inlined_call_operand.vmem [shape: f32[5,1,128], index: 11, kind: input, shape index: {}]   ;;  %s4647_s12 = inlined_call_operand.hbm [shape: f32[8,128], index: 12, kind: output, shape index: {}]  }
   0x1   :  { %4667 = sst [smem:[#allocation37_spill]] %s4635_s0 }
   0x2   :  { %4668 = sst [smem:[#allocation38_spill]] %s4636_s1 }
   0x3   :  { %4669 = sst [smem:[#allocation39_spill]] %s4637_s2 }
   0x4   :  { %4670 = sst [smem:[#allocation40_spill]] %s4638_s3 }
   0x5   :  { %4671 = sst [smem:[#allocation41_spill]] %s4639_s4 }
   0x6   :  { %4672 = sst [smem:[#allocation42_spill]] %s4640_s5 }
   0x7   :  { %4673 = sst [smem:[#allocation43_spill]] %s4641_s6 }
   0x8   :  { %4674 = sst [smem:[#allocation44_spill]] %s4642_s7 }
   0x9   :  { %4675 = sst [smem:[#allocation45_spill]] %s4643_s8 }
   0xa   :  { %4676 = sst [smem:[#allocation46_spill]] %s4646_s11 }
   0xb   :  { %4677 = sst [smem:[#allocation47_spill]] %s4647_s12 }
   0xc   :  { %17 = vsyncpa [#allocation6], 0 }
   0xd   :  { %19 = vsyncpa [#allocation6 + $0x1], 0 }
   0xe   :  { %20 = vsyncpa [#allocation9], 0 }
   0xf   :  { %21 = vsyncpa [#allocation12], 0 }
  0x10   :  { %23 = vsyncpa [#allocation12 + $0x1], 0 }
  0x11   :  { %24 = vsyncpa [#allocation15], 0 }
  0x12   :  { %26 = vsyncpa [#allocation15 + $0x1], 0 }
  0x13   :  { %27 = vsyncpa [#allocation18], 0 }
  0x14   :  { %29 = vsyncpa [#allocation18 + $0x1], 0 }
  0x15   :  { %30 = vsyncpa [#allocation7], 0  ;;  %s3883_s21 = smov 0   ;;  %s3885_s22 = smov 0  }
  0x16   :  { %s3887_s23 = smov 0   ;;  %s3889_s24 = smov 0  }
  0x17   :  { %s3891_s25 = smov 0   ;;  %s3893_s26 = smov 0  }
  0x18   :  { %s3895_s27 = smov 0   ;;  %s3897_s28 = smov 0  }
  0x19   :  { %s3899_s29 = smov 0   ;;  %s3901_s30 = smov 0  }
  0x1a   :  { %s3903_s13 = smov 0  }
  0x1b LB: > { %4678 = sst [smem:[#allocation26_spill]] %s3771_s22  ;;  %s3935_s14 = sadd.s32 4294967295, %s3807_s13   ;;  %s3807_s13 = sphi %s3903_s13, %s36_s13   ;;  %s3803_s30 = sphi %s3901_s30, %s4753_s30   ;;  %s3799_s29 = sphi %s3899_s29, %s4746_s29   ;;  %s3795_s28 = sphi %s3897_s28, %s4752_s28   ;;  %s3791_s27 = sphi %s3895_s27, %s4745_s27   ;;  %s3787_s26 = sphi %s3893_s26, %s4751_s26   ;;  %s3783_s25 = sphi %s3891_s25, %s4750_s25   ;;  %s3779_s24 = sphi %s3889_s24, %s4743_s24   ;;  %s3775_s23 = sphi %s3887_s23, %s4749_s23   ;;  %s3771_s22 = sphi %s3885_s22, %s4748_s22   ;;  %s3767_s21 = sphi %s3883_s21, %s4742_s21  }
  0x1c   : > { %4679 = sst [smem:[#allocation27_spill]] %s3783_s25  ;;  %p89_p0 = scmp.eq.s32.totalorder %s3807_s13, 0 }
  0x1d   : > { %4680 = sst [smem:[#allocation28_spill]] %s3791_s27  ;;  %p94_p1 = scmp.ne.s32.totalorder %s3783_s25, %s3779_s24 }
  0x1e   : > { %4681 = sst [smem:[#allocation29_spill]] %s3795_s28  ;;  %p95_p2 = scmp.eq.s32.totalorder %s3935_s14, 0 }
  0x1f   : > { %4682 = sst [smem:[#allocation30_spill]] %s3799_s29  ;;  %p156_p3 = scmp.ne.s32.totalorder %s3775_s23, %s3771_s22 }
  0x20   : > { %4683 = sst [smem:[#allocation31_spill]] %s3935_s14  ;;  %p3945_p4 = por %p95_p2, %p94_p1 }
  0x21   : > { %p162_p5 = scmp.ne.s32.totalorder %s3771_s22, %s3767_s21  ;;  %p3952_p6 = por %p156_p3, %p89_p0 }
  0x22   : > { %s4684_s16 = scalar_select %p3945_p4, 1, 0 }
  0x23   : > { %p2548_p7 = scmp.ge.s32.totalorder %s3807_s13, 1  ;;  %p3959_p8 = por %p162_p5, %p95_p2 }
  0x24   : > { %4685 = sst [smem:[#allocation32_spill]] %s4684_s16  ;;  %p376_p9 = scmp.lt.s32.totalorder %s3807_s13, 11 }
  0x25   : > { %s4687_s18 = scalar_select %p3959_p8, 1, 0 }
  0x26   : > { %s4689_s2 = sld [smem:[#allocation39_spill]]  ;;  %p3967_p10 = pnand %p2548_p7, %p376_p9 }
  0x27   : > { %4688 = sst [smem:[#allocation33_spill]] %s4687_s18  ;;  %s3809_s15 = smov [#allocation8]  }
  0x28   : > { %p3293_p11 = pneg %p3967_p10  ;;  %s390_s12 = sshll.u32 %s3809_s15, 4  ;;  %s391_s12 = int_to_ptr.vmem [resolvable:$true] %s390_s12 }
  0x29   : > { %p3321_p13 = scmp.lt.s32.totalorder %s3807_s13, 10  ;;  %s444_s19 = sand.u32 1, %s3807_s13  }
  0x2a   : > { %p3975_p12 = pnand %p3293_p11, %p95_p2  ;;  %s3984_s20 = sand.u32 1, %s3775_s23  }
  0x2b   : > { %s3990_s7 = sshll.u32 %s3803_s30, 6  ;;  %s4692_s4 = sld [smem:[#allocation41_spill]] }
  0x2c   : > { %s388_s24 = sshll.u32 %s4689_s2, 4  ;;  %s3987_s2 = sshll.u32 %s3984_s20, 6  ;;  %s389_s24 = int_to_ptr.hbm [resolvable:$true] %s388_s24 }
  0x2d   : > { %3296 = dma.hbm_to_vmem [thread:$0]  (!%p3975_p12), %s389_s24, 128, %s391_s12, [#allocation9]  }
  0x2e   : > { %s448_s27 = scalar_lea.vmem [#allocation11], %s3987_s2  ;;  %p4001_p1 = pnand %p3321_p13, %p3952_p6 }
  0x2f   : > { %s456_s28 = sshll.u32 %s448_s27, 4  ;;  %s4694_s8 = sld [smem:[#allocation45_spill]]  ;;  %s457_s28 = int_to_ptr.vmem [resolvable:$true] %s456_s28 }
  0x30   : > { %s4009_s5 = scalar_lea.sflag [#allocation12], %s444_s19  ;;  %s4657_s27 = smov 64  }
  0x31   : > { %s453_s0 = scalar_lea.hbm %s4692_s4, %s3990_s7  ;;  %s504_s15 = scalar_lea.vmem [#allocation14], %s3987_s2 }
  0x32   : > { %s454_s18 = sshll.u32 %s453_s0, 4  ;;  %s4659_s0 = smov 4   ;;  %s455_s18 = int_to_ptr.hbm [resolvable:$true] %s454_s18 }
  0x33   : > { %3306 = dma.hbm_to_vmem [thread:$0]  (!%p4001_p1), %s455_s18, 1024, %s457_s28, %s4009_s5, %s4657_s27, %s4657_s27, %s4659_s0  }
  0x34   : > { %s512_s22 = sshll.u32 %s504_s15, 4  ;;  %s4018_s24 = scalar_lea.sflag [#allocation15], %s444_s19  ;;  %s513_s22 = int_to_ptr.vmem [resolvable:$true] %s512_s22 }
  0x35   : > { %s509_s14 = scalar_lea.hbm %s4694_s8, %s3990_s7  ;;  %s4695_s3 = sld [smem:[#allocation40_spill]] }
  0x36   : > { %s510_s17 = sshll.u32 %s509_s14, 4  ;;  %s3812_s15 = smov [#allocation10]   ;;  %s511_s17 = int_to_ptr.hbm [resolvable:$true] %s510_s17 }
  0x37   : > { %3312 = dma.hbm_to_vmem [thread:$0]  (!%p4001_p1), %s511_s17, 1024, %s513_s22, %s4018_s24, %s4657_s27, %s4657_s27, %s4659_s0  }
  0x38   : > { %s401_s4 = sshll.u32 %s3812_s15, 4  ;;  %s48_s19 = sadd.s32 1, %s3803_s30  ;;  %s402_s4 = int_to_ptr.vmem [resolvable:$true] %s401_s4 }
  0x39   : > { %s45_s8 = sadd.s32 1, %s3799_s29  ;;  %s81_s17 = sadd.s32 1, %s3787_s26 }
  0x3a   : > { %p46_p3 = scmp.ge.s32.totalorder %s45_s8, 2  ;;  %p88_p5 = scmp.ne.s32.totalorder %s3787_s26, %s3783_s25 }
  0x3b   : > { %s399_s14 = sshll.u32 %s4695_s3, 4  ;;  %s421_s22 = sand.u32 1, %s3787_s26   ;;  %s400_s14 = int_to_ptr.hbm [resolvable:$true] %s399_s14 }
  0x3c   : > { %3299 = dma.hbm_to_vmem [thread:$0]  (!%p3975_p12), %s400_s14, 2048, %s402_s4, [#allocation9], %s4657_s27, %s4657_s27, %s4659_s0  }
  0x3d   : > { %s2858_s28 = sshll.u32 %s3799_s29, 7  ;;  %s4755_s8 = smov (%p46_p3, %s45_s8), 0 }
  0x3e   : > { %4696 = sst [smem:[#allocation34_spill]] %s4755_s8  ;;  %s4757_s19 = smov (!%p46_p3, %s48_s19), %s3803_s30 }
  0x3f   : > { %s78_s11 = ssub.s32 %s3799_s29, %s4755_s8  ;;  %p4048_p6 = por %p89_p0, %p88_p5 }
  0x40   : > { %p50_p7 = scmp.ge.s32.totalorder %s4757_s19, 5  ;;  %p79_p9 = scmp.eq.s32.totalorder %s78_s11, 0 }
  0x41   : > { %s2552_s18 = sshll.u32 %s421_s22, 7  ;;  %s4700_s1 = sld [smem:[#allocation38_spill]] }
  0x42   : > { %s4759_s19 = smov (%p50_p7, %s4757_s19), 0  ;;  %s425_s29 = scalar_lea.vmem [#allocation5], %s2552_s18 }
  0x43   : > { %4698 = sst [smem:[#allocation35_spill]] %s4759_s19  ;;  %s146_s15 = ssub.s32 %s3803_s30, %s4759_s19 }
  0x44   : > { %s4055_s14 = scalar_select %p79_p9, %s3787_s26, %s81_s17  }
  0x45   : > { %p147_p11 = scmp.eq.s32.totalorder %s146_s15, 0  ;;  %s434_s16 = sshll.u32 %s425_s29, 4  ;;  %s435_s16 = int_to_ptr.vmem [resolvable:$true] %s434_s16 }
  0x46   : > { %4699 = sst [smem:[#allocation36_spill]] %s4055_s14  ;;  %s4701_s25 = sadd.s32 1, %s3775_s23 }
  0x47   : > { %s431_s3 = scalar_lea.hbm %s4700_s1, %s2858_s28  ;;  %p3301_p0 = pnand %p3321_p13, %p4048_p6 }
  0x48   : > { %s432_s8 = sshll.u32 %s431_s3, 4  ;;  %s4702_s6 = sld [smem:[#allocation43_spill]]  ;;  %s433_s8 = int_to_ptr.hbm [resolvable:$true] %s432_s8 }
  0x49   : > { %s4065_s11 = scalar_select %p147_p11, %s3775_s23, %s4701_s25  }
  0x4a   : > { %s422_s0 = scalar_lea.sflag [#allocation6], %s421_s22  ;;  %s3813_s3 = smov 128  }
  0x4b   : > { %s3814_s29 = smov 8   ;;  %s476_s28 = scalar_lea.vmem [#allocation13], %s3987_s2 }
  0x4c   : > { %3303 = dma.hbm_to_vmem [thread:$0]  (!%p3301_p0), %s433_s8, 2048, %s435_s16, %s422_s0, %s3813_s3, %s3813_s3, %s3814_s29  }
  0x4d   : > { %s484_s18 = sshll.u32 %s476_s28, 4  ;;  %s4703_s4 = smov 4   ;;  %s485_s18 = int_to_ptr.vmem [resolvable:$true] %s484_s18 }
  0x4e   : > { %s481_s27 = scalar_lea.hbm %s4702_s6, %s3990_s7  ;;  %s4704_s1 = smov 64  }
  0x4f   : > { %s482_s25 = sshll.u32 %s481_s27, 4  ;;  %s528_s15 = scalar_lea.hbm %s4644_s9, %s3803_s30  ;;  %s483_s25 = int_to_ptr.hbm [resolvable:$true] %s482_s25 }
  0x50   : > { %3309 = dma.hbm_to_vmem [thread:$0]  (!%p4001_p1), %s483_s25, 1024, %s485_s18, %s4009_s5, %s4704_s1, %s4704_s1, %s4703_s4  }
  0x51   : > { %s530_s6 = sshll.u32 %s528_s15, 4  ;;  %s525_s19 = scalar_lea.vmem [#allocation16], %s3984_s20  ;;  %s531_s6 = int_to_ptr.hbm [resolvable:$true] %s530_s6 }
  0x52   : > { %s532_s14 = sshll.u32 %s525_s19, 4  ;;  %s548_s27 = scalar_lea.hbm %s4645_s10, %s3990_s7  ;;  %s533_s14 = int_to_ptr.vmem [resolvable:$true] %s532_s14 }
  0x53   : > { %3315 = dma.hbm_to_vmem [thread:$0]  (!%p4001_p1), %s531_s6, 16, %s533_s14, %s4018_s24  }
  0x54   : > { %s543_s0 = scalar_lea.vmem [#allocation17], %s3987_s2  ;;  %s549_s29 = sshll.u32 %s548_s27, 4  ;;  %s550_s29 = int_to_ptr.hbm [resolvable:$true] %s549_s29 }
  0x55   : > { %s551_s3 = sshll.u32 %s543_s0, 4  ;;  %s540_s5 = scalar_lea.sflag [#allocation18], %s3984_s20  ;;  %s552_s3 = int_to_ptr.vmem [resolvable:$true] %s551_s3 }
  0x56   : > { %3318 = dma.hbm_to_vmem [thread:$0]  (!%p4001_p1), %s550_s29, 1024, %s552_s3, %s540_s5, %s4704_s1, %s4704_s1, %s4703_s4  }
  0x57   : > { %569 = sbr.rel (%p3967_p10) target bundleno = 1824 (0x720), region = 68  ;;  %s4705_s19 = sld [smem:[#allocation27_spill]] (!%p3967_p10) }
  0x5d   : > { %s571_s24 = sand.u32 1, %s4705_s19  }
  0x5e   : > { %s2569_s14 = sshll.u32 %s571_s24, 7  ;;  %s572_s25 = scalar_lea.sflag [#allocation6], %s571_s24 }
  0x5f   : > { %s4104_s7 = scalar_lea.vmem [#allocation5], %s2569_s14 }
  0x60   : > { %3742 = dma.done.wait (%p3945_p4), %s572_s25, 2048  }
  0x61   : > { %3744 = vsyncadd (%p3945_p4), %s572_s25, 4294965248  ;;  %s4707_s2 = sld [smem:[#allocation31_spill]] }
  0x62   : > { %3746 = dma.done.wait (%p95_p2), [#allocation9], 2176  }
  0x63   : > { %3748 = vsyncadd (%p95_p2), [#allocation9], 4294965120  ;;  %s4708_s1 = sld [smem:[#allocation26_spill]] }
  0x67   : > { %s591_s20 = sand.u32 1, %s4707_s2  }
  0x68   : > { %s592_s18 = scalar_lea.sflag [#allocation12], %s591_s20 }
  0x69   : > { %s4116_s12 = sand.u32 1, %s4708_s1  }
  0x6a   : > { %s2572_s28 = sshll.u32 %s4116_s12, 6 }
  0x6b   : > { %s4119_s4 = scalar_lea.vmem [#allocation11], %s2572_s28 }
  0x6c   : > { %3750 = dma.done.wait (%p3959_p8), %s592_s18, 2048  }
  0x6d   : > { %3752 = vsyncadd (%p3959_p8), %s592_s18, 4294965248  ;;  %s4125_s22 = scalar_lea.vmem [#allocation13], %s2572_s28  ;;  %s612_s17 = scalar_lea.sflag [#allocation15], %s591_s20 }
  0x6e   : > { %s4127_s15 = scalar_lea.vmem [#allocation14], %s2572_s28 }
  0x6f   : > { %3754 = dma.done.wait (%p3959_p8), %s612_s17, 1040  }
  0x70   : > { %3756 = vsyncadd (%p3959_p8), %s612_s17, 4294966256  ;;  %s631_s16 = scalar_lea.sflag [#allocation18], %s4116_s12  ;;  %s4135_s27 = scalar_lea.vmem [#allocation17], %s2572_s28 }
  0x71   : > { %3758 = dma.done.wait (%p3959_p8), %s631_s16, 1024  }
  0x72   : > { %3760 = vsyncadd (%p3959_p8), %s631_s16, 4294966272  ;;  %s4710_s0 = sld [smem:[#allocation29_spill]] }
  0x73   : > { %s4711_s3 = sld [smem:[#allocation28_spill]] }
  0x74   : > { %s4712_s6 = sld [smem:[#allocation37_spill]] }
  0x75   : > { %s4713_s2 = sld [smem:[#allocation42_spill]] }
  0x76   : > { %s4714_s28 = sld [smem:[#allocation44_spill]] }
  0x77   : > { %s4715_s29 = sld [smem:[#allocation46_spill]] }
  0x78   : > { %p707_p2 = scmp.lt.s32.totalorder %s4710_s0, 4  ;;  %p722_p4 = scmp.eq.s32.totalorder %s4710_s0, 4 }
  0x79   : > { %p723_p10 = scmp.eq.s32.totalorder %s4710_s0, 0  ;;  %p724_p12 = scmp.eq.s32.totalorder %s4711_s3, 0 }
  0x7a   : > { %s4761_s0 = smov (!%p707_p2, %s4710_s0), 4 }
  0x7b   : > { %s709_s24 = scalar_lea.vmem %s4712_s6, %s4761_s0  ;;  %s713_s1 = scalar_lea.vmem %s4713_s2, %s4761_s0 }
  0x7c   : > { %s716_s18 = scalar_lea.vmem %s4714_s28, %s4761_s0  ;;  %p725_p8 = pnand %p724_p12, %p723_p10 }
  0x7d   : > { %s719_s8 = scalar_lea.vmem %s4715_s29, %s4761_s0 }
  0x7e   : > { %728 = sbr.rel (%p725_p8) target bundleno = 149 (0x95), region = 104 }
  0x83   : > { %v729_v0 = vld [vmem:[#allocation10] sm:$0xff]   ;;  %v731_v1 = vld [vmem:[#allocation10 + $0x8] sm:$0xff]   ;;  %v733_v2 = vld [vmem:[#allocation10 + $0x10] sm:$0xff]   ;;  %v3815_v16 = vmov 0.0  }
  0x84   : > { %761 = vst [vmem:[#allocation2] sm:$0xff] %v729_v0   ;;  %v735_v3 = vld [vmem:[#allocation10 + $0x18] sm:$0xff]   ;;  %v737_v4 = vld [vmem:[#allocation10 + $0x20] sm:$0xff]   ;;  %v739_v5 = vld [vmem:[#allocation10 + $0x28] sm:$0xff]  }
  0x85   : > { %763 = vst [vmem:[#allocation2 + $0x8] sm:$0xff] %v731_v1   ;;  %v741_v6 = vld [vmem:[#allocation10 + $0x30] sm:$0xff]   ;;  %v743_v7 = vld [vmem:[#allocation10 + $0x38] sm:$0xff]   ;;  %v745_v8 = vld [vmem:[#allocation10 + $0x40] sm:$0xff]  }
  0x86   : > { %765 = vst [vmem:[#allocation2 + $0x10] sm:$0xff] %v733_v2   ;;  %v747_v9 = vld [vmem:[#allocation10 + $0x48] sm:$0xff]   ;;  %v749_v10 = vld [vmem:[#allocation10 + $0x50] sm:$0xff]   ;;  %v751_v11 = vld [vmem:[#allocation10 + $0x58] sm:$0xff]  }
  0x87   : > { %767 = vst [vmem:[#allocation2 + $0x18] sm:$0xff] %v735_v3   ;;  %v753_v12 = vld [vmem:[#allocation10 + $0x60] sm:$0xff]   ;;  %v755_v13 = vld [vmem:[#allocation10 + $0x68] sm:$0xff]   ;;  %v757_v14 = vld [vmem:[#allocation10 + $0x70] sm:$0xff]  }
  0x88   : > { %769 = vst [vmem:[#allocation2 + $0x20] sm:$0xff] %v737_v4   ;;  %v759_v15 = vld [vmem:[#allocation10 + $0x78] sm:$0xff]  }
  0x89   : > { %771 = vst [vmem:[#allocation2 + $0x28] sm:$0xff] %v739_v5  }
  0x8a   : > { %773 = vst [vmem:[#allocation2 + $0x30] sm:$0xff] %v741_v6  }
  0x8b   : > { %775 = vst [vmem:[#allocation2 + $0x38] sm:$0xff] %v743_v7  }
  0x8c   : > { %777 = vst [vmem:[#allocation2 + $0x40] sm:$0xff] %v745_v8  }
  0x8d   : > { %779 = vst [vmem:[#allocation2 + $0x48] sm:$0xff] %v747_v9  }
  0x8e   : > { %781 = vst [vmem:[#allocation2 + $0x50] sm:$0xff] %v749_v10  }
  0x8f   : > { %783 = vst [vmem:[#allocation2 + $0x58] sm:$0xff] %v751_v11  }
  0x90   : > { %785 = vst [vmem:[#allocation2 + $0x60] sm:$0xff] %v753_v12  }
  0x91   : > { %787 = vst [vmem:[#allocation2 + $0x68] sm:$0xff] %v755_v13  }
  0x92   : > { %789 = vst [vmem:[#allocation2 + $0x70] sm:$0xff] %v757_v14  }
  0x93   : > { %791 = vst [vmem:[#allocation2 + $0x78] sm:$0xff] %v759_v15  }
  0x94   : > { %793 = vst [vmem:[#allocation4] sm:$0xff] %v3815_v16 }
  0x95 PF: > { %s4716_s3 = sld [smem:[#allocation28_spill]] }
  0x9b   : > { %p2577_p13 = scmp.ne.s32.totalorder %s4716_s3, 0 }
  0x9d   : > { %796 = sbr.rel (%p2577_p13) target bundleno = 1050 (0x41a), region = 108 }
  0xa2   : > { %v797_v17 = vld [vmem:[#allocation8] sm:$0xff]  ;;  %v798_v18 = vld [vmem:[#allocation4] sm:$0xff]  ;;  %vm880_vm0 = vcmask 1043456   ;;  %vm831_vm1 = vcmask 64512   ;;  %v3208_v6 = vld [vmem:[#allocation2 + $0x10] sm:$0xff]  }
  0xa3   : > { %v801_v19 = vunpack.c.l.b16 %v797_v17  ;;  %v802_v20 = vunpack.c.h.b16 %v797_v17  ;;  %v799_v21 = vpack.c.bf16 %v798_v18, %v798_v18  ;;  %v2928_v41 = vld [vmem:[#allocation2] sm:$0xff]   ;;  %v3207_v50 = vld [vmem:[#allocation2 + $0x8] sm:$0xff]   ;;  %v2937_v10 = vunpack.c.l.bf16 %v3208_v6  ;;  %v3213_v58 = vld [vmem:[#allocation2 + $0x38] sm:$0xff]  }
  0xa4   : > { %v2929_v42 = vunpack.c.l.bf16 %v2928_v41  ;;  %v2930_v46 = vunpack.c.h.bf16 %v2928_v41  ;;  %v3214_v48 = vld [vmem:[#allocation2 + $0x40] sm:$0xff]   ;;  %v2933_v54 = vunpack.c.l.bf16 %v3207_v50  ;;  %v2934_v62 = vunpack.c.h.bf16 %v3207_v50  ;;  %v3215_v2 = vld [vmem:[#allocation2 + $0x48] sm:$0xff]  }
  0xa5   : > { %v4166_v22 = vpack.c.b16 %v801_v19, %v801_v19  ;;  %v4168_v23 = vpack.c.b16 %v802_v20, %v802_v20  ;;  %v882_v24 = vsel %vm880_vm0, %v799_v21, 0  ;;  %v2961_v53 = vunpack.c.l.bf16 %v3214_v48 }
  0xa6   : > { %891 = vmatpush.bf16.msra.mxu0 %v882_v24  ;;  %3267 = vmatpush.bf16.msra.mxu2 %v882_v24  ;;  %v2962_v61 = vunpack.c.h.bf16 %v3214_v48  ;;  %v2965_v9 = vunpack.c.l.bf16 %v3215_v2  ;;  %v2966_v17 = vunpack.c.h.bf16 %v3215_v2  ;;  %v2938_v18 = vunpack.c.h.bf16 %v3208_v6 }
  0xa7   : > { %807 = vxpose.binary.xlu0.c.b16.start.end [1/2] (short) %v4168_v23, %v4166_v22, 128  ;;  %v2957_v45 = vunpack.c.l.bf16 %v3213_v58 }
  0xa8   : > { %3266 = vmatpush.bf16.msra.mxu1 %v882_v24  ;;  %3268 = vmatpush.bf16.msra.mxu3 %v882_v24  ;;  %v3216_v24 = vld [vmem:[#allocation2 + $0x50] sm:$0xff]  }
 0x153   : > { %v815_v25 = vpop.trf.xlu0 }
 0x154   : > { %2578 = vmatmul.msk.bf16.vlgmr.msra.gmra.mxu0 %vm831_vm1, %v815_v25 }
 0x15b   : > { %v816_v26 = vpop.trf.xlu0 }
 0x15c   : > { %2586 = vmatmul.msk.bf16.vlgmr.msra.gmra.mxu2 %vm831_vm1, %v816_v26 }
 0x163   : > { %v817_v27 = vpop.trf.xlu0 }
 0x164   : > { %2579 = vmatmul.msk.bf16.gmra.mxu0 %vm831_vm1, %v817_v27 }
 0x16b   : > { %v818_v28 = vpop.trf.xlu0 }
 0x16c   : > { %2587 = vmatmul.msk.bf16.gmra.mxu2 %vm831_vm1, %v818_v28  ;;  %v3209_v28 = vld [vmem:[#allocation2 + $0x18] sm:$0xff]  }
 0x173   : > { %v819_v29 = vpop.trf.xlu0 }
 0x174   : > { %2580 = vmatmul.msk.bf16.gmra.mxu0 %vm831_vm1, %v819_v29 }
 0x17b   : > { %v820_v30 = vpop.trf.xlu0 }
 0x17c   : > { %2588 = vmatmul.msk.bf16.gmra.mxu2 %vm831_vm1, %v820_v30 }
 0x183   : > { %v821_v31 = vpop.trf.xlu0 }
 0x184   : > { %2581 = vmatmul.msk.bf16.gmra.mxu0 %vm831_vm1, %v821_v31  ;;  %v2969_v31 = vunpack.c.l.bf16 %v3216_v24 }
 0x18b   : > { %v822_v32 = vpop.trf.xlu0 }
 0x18c   : > { %2589 = vmatmul.msk.bf16.gmra.mxu2 %vm831_vm1, %v822_v32  ;;  %v2941_v32 = vunpack.c.l.bf16 %v3209_v28 }
 0x193   : > { %v823_v33 = vpop.trf.xlu0 }
 0x194   : > { %2582 = vmatmul.msk.bf16.vlgmr.msra.gmra.mxu1 %vm831_vm1, %v823_v33 }
 0x19b   : > { %v824_v34 = vpop.trf.xlu0 }
 0x19c   : > { %2590 = vmatmul.msk.bf16.vlgmr.msra.gmra.mxu3 %vm831_vm1, %v824_v34 }
 0x1a3   : > { %v825_v35 = vpop.trf.xlu0 }
 0x1a4   : > { %2583 = vmatmul.msk.bf16.gmra.mxu1 %vm831_vm1, %v825_v35 }
 0x1ab   : > { %v826_v36 = vpop.trf.xlu0 }
 0x1ac   : > { %2591 = vmatmul.msk.bf16.gmra.mxu3 %vm831_vm1, %v826_v36 }
 0x1b3   : > { %v827_v37 = vpop.trf.xlu0 }
 0x1b4   : > { %2584 = vmatmul.msk.bf16.gmra.mxu1 %vm831_vm1, %v827_v37 }
 0x1bb   : > { %v828_v38 = vpop.trf.xlu0 }
 0x1bc   : > { %2592 = vmatmul.msk.bf16.gmra.mxu3 %vm831_vm1, %v828_v38 }
 0x1c3   : > { %v829_v39 = vpop.trf.xlu0 }
 0x1c4   : > { %2585 = vmatmul.msk.bf16.gmra.mxu1 %vm831_vm1, %v829_v39  ;;  %v2970_v39 = vunpack.c.h.bf16 %v3216_v24 }
 0x1cb   : > { %v830_v40 = vpop.trf.xlu0 }
 0x1cc   : > { %2593 = vmatmul.msk.bf16.gmra.mxu3 %vm831_vm1, %v830_v40  ;;  %v2942_v40 = vunpack.c.h.bf16 %v3209_v28 }
 0x1d1   : > { %v893_v43 = vpop.f32.mrf.mxu0 }
 0x1d2   : > { %v4188_v44 = vadd.f32 %v2929_v42, %v893_v43 }
 0x1d9   : > { %v895_v47 = vpop.f32.mrf.mxu0 }
 0x1da   : > { %v4192_v49 = vadd.f32 %v2930_v46, %v895_v47  ;;  %v3217_v46 = vld [vmem:[#allocation2 + $0x58] sm:$0xff]  }
 0x1db   : > { %v2974_v6 = vunpack.c.h.bf16 %v3217_v46 }
 0x1dc   : > { %v2994_v52 = vpack.c.bf16 %v4192_v49, %v4188_v44 }
 0x1de   : > { %2995 = vst [vmem:[#allocation3] sm:$0xff] %v2994_v52   ;;  %v3210_v52 = vld [vmem:[#allocation2 + $0x20] sm:$0xff]  }
 0x1df   : > { %v933_v55 = vpop.f32.mrf.mxu2 }
 0x1e0   : > { %v4198_v56 = vadd.f32 %v2961_v53, %v933_v55  ;;  %v2973_v55 = vunpack.c.l.bf16 %v3217_v46 }
 0x1e1   : > { %v898_v57 = vpop.f32.mrf.mxu0 }
 0x1e2   : > { %v4202_v59 = vadd.f32 %v2933_v54, %v898_v57  ;;  %v2945_v57 = vunpack.c.l.bf16 %v3210_v52 }
 0x1e7   : > { %v935_v63 = vpop.f32.mrf.mxu2 }
 0x1e8   : > { %v4206_v0 = vadd.f32 %v2962_v61, %v935_v63 }
 0x1e9   : > { %v900_v1 = vpop.f32.mrf.mxu0 }
 0x1ea   : > { %v3034_v4 = vpack.c.bf16 %v4206_v0, %v4198_v56  ;;  %v4212_v5 = vadd.f32 %v2934_v62, %v900_v1 }
 0x1ec   : > { %3229 = vst [vmem:[#allocation3 + $0x40] sm:$0xff] %v3034_v4   ;;  %v2999_v8 = vpack.c.bf16 %v4212_v5, %v4202_v59 }
 0x1ee   : > { %3222 = vst [vmem:[#allocation3 + $0x8] sm:$0xff] %v2999_v8   ;;  %v2946_v8 = vunpack.c.h.bf16 %v3210_v52 }
 0x1ef   : > { %v938_v11 = vpop.f32.mrf.mxu2 }
 0x1f0   : > { %v4218_v12 = vadd.f32 %v2965_v9, %v938_v11 }
 0x1f1   : > { %v903_v13 = vpop.f32.mrf.mxu0 }
 0x1f2   : > { %v4222_v15 = vadd.f32 %v2937_v10, %v903_v13  ;;  %v3218_v13 = vld [vmem:[#allocation2 + $0x60] sm:$0xff]  }
 0x1f3   : > { %v2977_v28 = vunpack.c.l.bf16 %v3218_v13 }
 0x1f4   : > { %v1073_v16 = vpack.c.bf16 %v4222_v15, %v4222_v15 }
 0x1f7   : > { %v940_v19 = vpop.f32.mrf.mxu2 }
 0x1f8   : > { %v4226_v20 = vadd.f32 %v2966_v17, %v940_v19 }
 0x1f9   : > { %v905_v21 = vpop.f32.mrf.mxu0 }
 0x1fa   : > { %v3039_v26 = vpack.c.bf16 %v4226_v20, %v4218_v12  ;;  %v4232_v27 = vadd.f32 %v2938_v18, %v905_v21  ;;  %v3211_v21 = vld [vmem:[#allocation2 + $0x28] sm:$0xff]  }
 0x1fc   : > { %3230 = vst [vmem:[#allocation3 + $0x48] sm:$0xff] %v3039_v26   ;;  %v3004_v30 = vpack.c.bf16 %v4232_v27, %v4222_v15 }
 0x1fe   : > { %3223 = vst [vmem:[#allocation3 + $0x10] sm:$0xff] %v3004_v30   ;;  %v2949_v30 = vunpack.c.l.bf16 %v3211_v21 }
 0x1ff   : > { %v943_v33 = vpop.f32.mrf.mxu2 }
 0x200   : > { %v4238_v34 = vadd.f32 %v2969_v31, %v943_v33 }
 0x201   : > { %v908_v35 = vpop.f32.mrf.mxu0 }
 0x202   : > { %v4242_v37 = vadd.f32 %v2941_v32, %v908_v35 }
 0x204   : > { %v1075_v38 = vpack.c.bf16 %v4242_v37, %v4242_v37 }
 0x207   : > { %v945_v41 = vpop.f32.mrf.mxu2 }
 0x208   : > { %v4246_v42 = vadd.f32 %v2970_v39, %v945_v41  ;;  %v2978_v41 = vunpack.c.h.bf16 %v3218_v13 }
 0x209   : > { %v910_v43 = vpop.f32.mrf.mxu0 }
 0x20a   : > { %v3044_v48 = vpack.c.bf16 %v4246_v42, %v4238_v34  ;;  %v4252_v50 = vadd.f32 %v2942_v40, %v910_v43  ;;  %v2950_v43 = vunpack.c.h.bf16 %v3211_v21 }
 0x20c   : > { %3231 = vst [vmem:[#allocation3 + $0x50] sm:$0xff] %v3044_v48   ;;  %v1076_v53 = vpack.c.bf16 %v4252_v50, %v4252_v50  ;;  %v3009_v54 = vpack.c.bf16 %v4252_v50, %v4242_v37 }
 0x20e   : > { %3224 = vst [vmem:[#allocation3 + $0x18] sm:$0xff] %v3009_v54   ;;  %v3219_v54 = vld [vmem:[#allocation2 + $0x68] sm:$0xff]  }
 0x20f   : > { %v948_v61 = vpop.f32.mrf.mxu2 }
 0x210   : > { %v4258_v62 = vadd.f32 %v2973_v55, %v948_v61 }
 0x211   : > { %v913_v63 = vpop.f32.mrf.mxu1 }
 0x212   : > { %v1091_v1 = vpack.c.bf16 %v4258_v62, %v4258_v62  ;;  %v4262_v2 = vadd.f32 %v2945_v57, %v913_v63  ;;  %v3212_v63 = vld [vmem:[#allocation2 + $0x30] sm:$0xff]  }
 0x214   : > { %v1077_v4 = vpack.c.bf16 %v4262_v2, %v4262_v2 }
 0x217   : > { %v950_v9 = vpop.f32.mrf.mxu2 }
 0x218   : > { %v4266_v10 = vadd.f32 %v2974_v6, %v950_v9  ;;  %v2981_v9 = vunpack.c.l.bf16 %v3219_v54 }
 0x219   : > { %v915_v11 = vpop.f32.mrf.mxu1 }
 0x21a   : > { %v1092_v17 = vpack.c.bf16 %v4266_v10, %v4266_v10  ;;  %v3049_v18 = vpack.c.bf16 %v4266_v10, %v4258_v62  ;;  %v4272_v19 = vadd.f32 %v2946_v8, %v915_v11  ;;  %v2953_v11 = vunpack.c.l.bf16 %v3212_v63 }
 0x21c   : > { %3232 = vst [vmem:[#allocation3 + $0x58] sm:$0xff] %v3049_v18   ;;  %v1078_v24 = vpack.c.bf16 %v4272_v19, %v4272_v19  ;;  %v3014_v26 = vpack.c.bf16 %v4272_v19, %v4262_v2 }
 0x21e   : > { %3225 = vst [vmem:[#allocation3 + $0x20] sm:$0xff] %v3014_v26  }
 0x21f   : > { %v953_v31 = vpop.f32.mrf.mxu3 }
 0x220   : > { %v4278_v32 = vadd.f32 %v2977_v28, %v953_v31  ;;  %v2982_v31 = vunpack.c.h.bf16 %v3219_v54 }
 0x221   : > { %v918_v33 = vpop.f32.mrf.mxu1 }
 0x222   : > { %v1093_v35 = vpack.c.bf16 %v4278_v32, %v4278_v32  ;;  %v4282_v39 = vadd.f32 %v2949_v30, %v918_v33  ;;  %v2954_v33 = vunpack.c.h.bf16 %v3212_v63 }
 0x224   : > { %v1079_v40 = vpack.c.bf16 %v4282_v39, %v4282_v39 }
 0x227   : > { %v955_v46 = vpop.f32.mrf.mxu3 }
 0x228   : > { %v4286_v48 = vadd.f32 %v2978_v41, %v955_v46 }
 0x229   : > { %v920_v52 = vpop.f32.mrf.mxu1 }
 0x22a   : > { %v1094_v55 = vpack.c.bf16 %v4286_v48, %v4286_v48  ;;  %v3054_v57 = vpack.c.bf16 %v4286_v48, %v4278_v32  ;;  %v4292_v61 = vadd.f32 %v2950_v43, %v920_v52  ;;  %v3220_v52 = vld [vmem:[#allocation2 + $0x70] sm:$0xff]  }
 0x22b   : > { %v2985_v51 = vunpack.c.l.bf16 %v3220_v52 }
 0x22c   : > { %3233 = vst [vmem:[#allocation3 + $0x60] sm:$0xff] %v3054_v57   ;;  %v1080_v6 = vpack.c.bf16 %v4292_v61, %v4292_v61  ;;  %v3019_v8 = vpack.c.bf16 %v4292_v61, %v4282_v39 }
 0x22e   : > { %3226 = vst [vmem:[#allocation3 + $0x28] sm:$0xff] %v3019_v8  }
 0x22f   : > { %v958_v13 = vpop.f32.mrf.mxu3 }
 0x230   : > { %v4298_v18 = vadd.f32 %v2981_v9, %v958_v13 }
 0x231   : > { %v923_v21 = vpop.f32.mrf.mxu1 }
 0x232   : > { %v1095_v26 = vpack.c.bf16 %v4298_v18, %v4298_v18  ;;  %v1049_v28 = vadd.f32 %v2953_v11, %v923_v21 }
 0x234   : > { %v1081_v30 = vpack.c.bf16 %v1049_v28, %v1049_v28 }
 0x237   : > { %v960_v41 = vpop.f32.mrf.mxu3 }
 0x238   : > { %v1064_v43 = vadd.f32 %v2982_v31, %v960_v41  ;;  %v2986_v31 = vunpack.c.h.bf16 %v3220_v52  ;;  %v2958_v41 = vunpack.c.h.bf16 %v3213_v58 }
 0x239   : > { %v925_v46 = vpop.f32.mrf.mxu1 }
 0x23a   : > { %v1096_v57 = vpack.c.bf16 %v1064_v43, %v1064_v43  ;;  %v3059_v3 = vpack.c.bf16 %v1064_v43, %v4298_v18  ;;  %v1050_v8 = vadd.f32 %v2954_v33, %v925_v46  ;;  %v3221_v43 = vld [vmem:[#allocation2 + $0x78] sm:$0xff]  }
 0x23b   : > { %v2990_v29 = vunpack.c.h.bf16 %v3221_v43 }
 0x23c   : > { %3234 = vst [vmem:[#allocation3 + $0x68] sm:$0xff] %v3059_v3   ;;  %v1082_v9 = vpack.c.bf16 %v1050_v8, %v1050_v8  ;;  %v3024_v13 = vpack.c.bf16 %v1050_v8, %v1049_v28 }
 0x23e   : > { %3227 = vst [vmem:[#allocation3 + $0x30] sm:$0xff] %v3024_v13   ;;  %v2989_v13 = vunpack.c.l.bf16 %v3221_v43 }
 0x23f   : > { %v963_v25 = vpop.f32.mrf.mxu3 }
 0x240   : > { %v1065_v11 = vadd.f32 %v2985_v51, %v963_v25 }
 0x241   : > { %v928_v21 = vpop.f32.mrf.mxu1 }
 0x242   : > { %v1097_v54 = vpack.c.bf16 %v1065_v11, %v1065_v11  ;;  %v1051_v63 = vadd.f32 %v2957_v45, %v928_v21 }
 0x244   : > { %v1083_v14 = vpack.c.bf16 %v1051_v63, %v1051_v63 }
 0x247   : > { %v965_v7 = vpop.f32.mrf.mxu3 }
 0x248   : > { %v1066_v60 = vadd.f32 %v2986_v31, %v965_v7 }
 0x249   : > { %v930_v47 = vpop.f32.mrf.mxu1 }
 0x24a   : > { %v1098_v33 = vpack.c.bf16 %v1066_v60, %v1066_v60  ;;  %v3064_v46 = vpack.c.bf16 %v1066_v60, %v1065_v11  ;;  %v1052_v3 = vadd.f32 %v2958_v41, %v930_v47 }
 0x24c   : > { %3235 = vst [vmem:[#allocation3 + $0x70] sm:$0xff] %v3064_v46   ;;  %v1084_v28 = vpack.c.bf16 %v1052_v3, %v1052_v3  ;;  %v3029_v8 = vpack.c.bf16 %v1052_v3, %v1051_v63 }
 0x24e   : > { %3228 = vst [vmem:[#allocation3 + $0x38] sm:$0xff] %v3029_v8  }
 0x24f   : > { %v968_v36 = vpop.f32.mrf.mxu3 }
 0x250   : > { %v1067_v51 = vadd.f32 %v2989_v13, %v968_v36 }
 0x252   : > { %v1099_v25 = vpack.c.bf16 %v1067_v51, %v1067_v51 }
 0x257   : > { %v970_v45 = vpop.f32.mrf.mxu3 }
 0x258   : > { %v1068_v21 = vadd.f32 %v2990_v29, %v970_v45  ;;  %1136 = sbr.rel (%p722_p4) target bundleno = 1050 (0x41a), region = 112 }
 0x25a   : > { %v1100_v52 = vpack.c.bf16 %v1068_v21, %v1068_v21  ;;  %v3069_v58 = vpack.c.bf16 %v1068_v21, %v1067_v51 }
 0x25c   : > { %3236 = vst [vmem:[#allocation3 + $0x78] sm:$0xff] %v3069_v58  }
 0x25d   : > { %v1184_v7 = vunpack.c.l.b16 %v1083_v14  ;;  %v1185_v60 = vunpack.c.l.b16 %v1084_v28  ;;  %v1200_v47 = vunpack.c.l.b16 %v1099_v25  ;;  %v1201_v11 = vunpack.c.l.b16 %v1100_v52  ;;  %v2870_v14 = vld [vmem:[%s4127_s15 + $0x38] sm:$0xff]  ;;  %v2867_v37 = vld [vmem:[%s4127_s15 + $0x20] sm:$0xff]  ;;  %v2865_v52 = vld [vmem:[%s4127_s15 + $0x10] sm:$0xff] }
 0x25e   : > { %v1182_v63 = vunpack.c.l.b16 %v1081_v30  ;;  %v1183_v31 = vunpack.c.l.b16 %v1082_v9  ;;  %v1198_v41 = vunpack.c.l.b16 %v1097_v54  ;;  %v1199_v36 = vunpack.c.l.b16 %v1098_v33  ;;  %1329 = vmatpush.bf16.msra.mxu2 %v2870_v14  ;;  %v2869_v33 = vld [vmem:[%s4127_s15 + $0x30] sm:$0xff] }
 0x25f   : > { %v1209_v46 = vpack.c.b16 %v1185_v60, %v1184_v7  ;;  %v1217_v43 = vpack.c.b16 %v1201_v11, %v1200_v47  ;;  %v1180_v29 = vunpack.c.l.b16 %v1079_v40  ;;  %v1181_v3 = vunpack.c.l.b16 %v1080_v6 }
 0x260   : > { %v1208_v28 = vpack.c.b16 %v1183_v31, %v1182_v63  ;;  %v1216_v30 = vpack.c.b16 %v1199_v36, %v1198_v41  ;;  %v1196_v9 = vunpack.c.l.b16 %v1095_v26  ;;  %v1197_v54 = vunpack.c.l.b16 %v1096_v57  ;;  %v2868_v26 = vld [vmem:[%s4127_s15 + $0x28] sm:$0xff]  ;;  %v2866_v57 = vld [vmem:[%s4127_s15 + $0x18] sm:$0xff] }
 0x261   : > { %1234 = vmatpush.bf16.msra.mxu0 %v1209_v46  ;;  %1247 = vmatpush.bf16.msra.mxu1 %v1217_v43  ;;  %v1207_v8 = vpack.c.b16 %v1181_v3, %v1180_v29  ;;  %v1178_v39 = vunpack.c.l.b16 %v1077_v4  ;;  %v1179_v61 = vunpack.c.l.b16 %v1078_v24  ;;  %v1194_v6 = vunpack.c.l.b16 %v1093_v35  ;;  %v2877_v41 = vld [vmem:[%s4135_s27 + $0x30] sm:$0xff]  ;;  %v2876_v36 = vld [vmem:[%s4135_s27 + $0x28] sm:$0xff]  ;;  %v2875_v46 = vld [vmem:[%s4135_s27 + $0x20] sm:$0xff] }
 0x262   : > { %v1215_v40 = vpack.c.b16 %v1197_v54, %v1196_v9  ;;  %v1195_v18 = vunpack.c.l.b16 %v1094_v55  ;;  %1330 = vmatpush.bf16.msra.mxu2 %v2869_v33  ;;  %v1176_v2 = vunpack.c.l.b16 %v1075_v38  ;;  %v1177_v4 = vunpack.c.l.b16 %v1076_v53  ;;  %v2874_v43 = vld [vmem:[%s4135_s27 + $0x18] sm:$0xff]  ;;  %v1137_v29 = vld [vmem:[#allocation4] sm:$0xff] }
 0x263   : > { %v1206_v19 = vpack.c.b16 %v1179_v61, %v1178_v39  ;;  %v1192_v32 = vunpack.c.l.b16 %v1091_v1  ;;  %v1193_v35 = vunpack.c.l.b16 %v1092_v17  ;;  %v1174_v50 = vunpack.c.l.b16 %v1073_v16  ;;  %v2872_v33 = vld [vmem:[%s4135_s27 + $0x8] sm:$0xff] }
 0x264   : > { %v1214_v24 = vpack.c.b16 %v1195_v18, %v1194_v6  ;;  %v1205_v38 = vpack.c.b16 %v1177_v4, %v1176_v2  ;;  %v4718_v48 = vpack.c.bf16 %v4232_v27, %v4232_v27  ;;  %v4719_v1 = vpack.c.bf16 %v4238_v34, %v4238_v34  ;;  %v3425_v2 = vld [vmem:[%s719_s8] ss:$0 sm:$0xff] }
 0x265   : > { %1235 = vmatpush.bf16.msra.mxu0 %v1208_v28  ;;  %1248 = vmatpush.bf16.msra.mxu1 %v1216_v30  ;;  %v1213_v53 = vpack.c.b16 %v1193_v35, %v1192_v32  ;;  %v4720_v17 = vpack.c.bf16 %v4246_v42, %v4246_v42  ;;  %v4721_v15 = vpack.c.bf16 %v4202_v59, %v4202_v59 }
 0x266   : > { %1331 = vmatpush.bf16.msra.mxu2 %v2868_v26  ;;  %v1175_v62 = vunpack.c.l.b16 %v4718_v48  ;;  %v1190_v10 = vunpack.c.l.b16 %v4719_v1  ;;  %v4722_v13 = vpack.c.bf16 %v4212_v5, %v4212_v5  ;;  %v4723_v34 = vpack.c.bf16 %v4218_v12, %v4218_v12 }
 0x267   : > { %v1191_v55 = vunpack.c.l.b16 %v4720_v17  ;;  %v1172_v16 = vunpack.c.l.b16 %v4721_v15  ;;  %v4724_v42 = vpack.c.bf16 %v4226_v20, %v4226_v20  ;;  %v4725_v58 = vpack.c.bf16 %v4188_v44, %v4188_v44 }
 0x268   : > { %v1173_v51 = vunpack.c.l.b16 %v4722_v13  ;;  %v1204_v27 = vpack.c.b16 %v1175_v62, %v1174_v50  ;;  %v1188_v45 = vunpack.c.l.b16 %v4723_v34  ;;  %v4726_v12 = vpack.c.bf16 %v4192_v49, %v4192_v49  ;;  %v2864_v49 = vld [vmem:[%s4127_s15 + $0x8] sm:$0xff] }
 0x269   : > { %1236 = vmatpush.bf16.msra.mxu0 %v1207_v8  ;;  %1249 = vmatpush.bf16.msra.mxu1 %v1215_v40  ;;  %v1212_v25 = vpack.c.b16 %v1191_v55, %v1190_v10  ;;  %v1189_v21 = vunpack.c.l.b16 %v4724_v42  ;;  %v1170_v5 = vunpack.c.l.b16 %v4725_v58  ;;  %v4727_v20 = vpack.c.bf16 %v4198_v56, %v4198_v56  ;;  %v2863_v56 = vld [vmem:[%s4127_s15] sm:$0xff]  ;;  %s4729_s15 = scalar_lea.vmem [#allocation16], %s4116_s12 }
 0x26a   : > { %1332 = vmatpush.bf16.msra.mxu2 %v2867_v37  ;;  %v1203_v59 = vpack.c.b16 %v1173_v51, %v1172_v16  ;;  %v1171_v60 = vunpack.c.l.b16 %v4726_v12  ;;  %v4728_v11 = vpack.c.bf16 %v4206_v0, %v4206_v0  ;;  %v2878_v0 = vld [vmem:[%s4135_s27 + $0x38] sm:$0xff]  ;;  %v2871_v8 = vld [vmem:[%s4135_s27] sm:$0xff] }
 0x26b   : > { %v1211_v7 = vpack.c.b16 %v1189_v21, %v1188_v45  ;;  %v1186_v47 = vunpack.c.l.b16 %v4727_v20  ;;  %1412 = vmatpush.bf16.msra.mxu3 %v2878_v0  ;;  %v3424_v39 = vld [vmem:[%s4729_s15] ss:$0 sm:$0xff] }
 0x26c   : > { %v1187_v63 = vunpack.c.l.b16 %v4728_v11  ;;  %v1202_v44 = vpack.c.b16 %v1171_v60, %v1170_v5 }
 0x26d   : > { %1237 = vmatpush.bf16.msra.mxu0 %v1206_v19  ;;  %1250 = vmatpush.bf16.msra.mxu1 %v1214_v24 }
 0x26e   : > { %1333 = vmatpush.bf16.msra.mxu2 %v2866_v57  ;;  %v1210_v31 = vpack.c.b16 %v1187_v63, %v1186_v47 }
 0x26f   : > { %1413 = vmatpush.bf16.msra.mxu3 %v2877_v41 }
 0x271   : > { %1238 = vmatpush.bf16.msra.mxu0 %v1205_v38  ;;  %1251 = vmatpush.bf16.msra.mxu1 %v1213_v53 }
 0x272   : > { %1334 = vmatpush.bf16.msra.mxu2 %v2865_v52 }
 0x273   : > { %1414 = vmatpush.bf16.msra.mxu3 %v2876_v36 }
 0x275   : > { %1239 = vmatpush.bf16.msra.mxu0 %v1204_v27  ;;  %1252 = vmatpush.bf16.msra.mxu1 %v1212_v25 }
 0x276   : > { %1335 = vmatpush.bf16.msra.mxu2 %v2864_v49 }
 0x277   : > { %1415 = vmatpush.bf16.msra.mxu3 %v2875_v46 }
 0x279   : > { %1240 = vmatpush.bf16.msra.mxu0 %v1203_v59  ;;  %1253 = vmatpush.bf16.msra.mxu1 %v1211_v7 }
 0x27a   : > { %1336 = vmatpush.bf16.msra.mxu2 %v2863_v56 }
 0x27b   : > { %1416 = vmatpush.bf16.msra.mxu3 %v2874_v43 }
 0x27d   : > { %1241 = vmatpush.bf16.msra.mxu0 %v1202_v44  ;;  %1254 = vmatpush.bf16.msra.mxu1 %v1210_v31 }
 0x280   : > { %1242 = vmatmul.bf16.vlgmr.msra.gmra.mxu0 %v4166_v22  ;;  %1255 = vmatmul.bf16.vlgmr.msra.gmra.mxu1 %v4168_v23  ;;  %v2873_v22 = vld [vmem:[%s4135_s27 + $0x10] sm:$0xff] }
 0x281   : > { %1417 = vmatpush.bf16.msra.mxu3 %v2873_v22 }
 0x285   : > { %1418 = vmatpush.bf16.msra.mxu3 %v2872_v33 }
 0x289   : > { %1419 = vmatpush.bf16.msra.mxu3 %v2871_v8 }
 0x2fd   : > { %v1243_v23 = vpop.f32.mrf.mxu0  ;;  %v1256_v3 = vpop.f32.mrf.mxu1 }
 0x2fe   : > { %v1244_v14 = vadd.f32 %v1243_v23, %v1137_v29 }
 0x300   : > { %v1257_v28 = vadd.f32 %v1256_v3, %v1244_v14 }
 0x302   : > { %v1260_v30 = vpack.c.bf16 %v1257_v28, %v1257_v28 }
 0x304   : > { %1337 = vmatmul.bf16.vlgmr.msra.gmra.mxu2 %v1260_v30 }
 0x305   : > { %v1245_v9 = vpop.f32.mrf.mxu0  ;;  %v1258_v54 = vpop.f32.mrf.mxu1 }
 0x387   : > { %v1338_v40 = vpop.f32.mrf.mxu2 }
 0x388   : > { %v1339_v61 = vadd.f32 %v3424_v39, %v1338_v40 }
 0x38a   : > { %v1342_v6 = vmax.f32 %v1339_v61, 0.0 }
 0x38c   : > { %v1343_v18 = vpack.c.bf16 %v1342_v6, %v1342_v6 }
 0x38e   : > { %1420 = vmatmul.bf16.vlgmr.msra.gmra.mxu3 %v1343_v18 }
 0x38f   : > { %v1340_v26 = vpop.f32.mrf.mxu2 }
 0x411   : > { %v1421_v4 = vpop.f32.mrf.mxu3 }
 0x412   : > { %v1422_v19 = vadd.f32 %v3425_v2, %v1421_v4 }
 0x414   : > { %v1425_v24 = vmax.f32 %v1422_v19, 0.0 }
 0x416   : > { %1426 = vst [vmem:[#allocation4] sm:$0xff] %v1425_v24 }
 0x419   : > { %v1423_v32 = vpop.f32.mrf.mxu3 }
 0x41a PF: > { %v3250_v35 = vld [vmem:[#allocation3 + $0x38] sm:$0xff]   ;;  %v3249_v38 = vld [vmem:[#allocation3 + $0x30] sm:$0xff]   ;;  %v3248_v15 = vld [vmem:[#allocation3 + $0x28] sm:$0xff]   ;;  %s2091_s3 = scalar_select %p722_p4, 1, 0 }
 0x41b   : > { %v3133_v50 = vunpack.c.l.bf16 %v3250_v35  ;;  %v3134_v53 = vunpack.c.h.bf16 %v3250_v35  ;;  %v3257_v1 = vld [vmem:[#allocation3 + $0x70] sm:$0xff]   ;;  %v3129_v10 = vunpack.c.l.bf16 %v3249_v38  ;;  %v3130_v17 = vunpack.c.h.bf16 %v3249_v38  ;;  %v3256_v25 = vld [vmem:[#allocation3 + $0x68] sm:$0xff]   ;;  %v3247_v52 = vld [vmem:[#allocation3 + $0x20] sm:$0xff]  }
 0x41c   : > { %v3161_v55 = vunpack.c.l.bf16 %v3257_v1  ;;  %v3162_v57 = vunpack.c.h.bf16 %v3257_v1  ;;  %v3125_v5 = vunpack.c.l.bf16 %v3248_v15  ;;  %v3126_v7 = vunpack.c.h.bf16 %v3248_v15  ;;  %v3255_v12 = vld [vmem:[#allocation3 + $0x60] sm:$0xff]   ;;  %v3246_v56 = vld [vmem:[#allocation3 + $0x18] sm:$0xff]   ;;  %v3245_v23 = vld [vmem:[#allocation3 + $0x10] sm:$0xff]  }
 0x41d   : > { %v1541_v16 = vmax.f32 %v3133_v50, 0.0  ;;  %v1542_v13 = vmax.f32 %v3134_v53, 0.0  ;;  %v1539_v34 = vmax.f32 %v3129_v10, 0.0  ;;  %v1540_v45 = vmax.f32 %v3130_v17, 0.0  ;;  %v3254_v43 = vld [vmem:[#allocation3 + $0x58] sm:$0xff]   ;;  %v3253_v9 = vld [vmem:[#allocation3 + $0x50] sm:$0xff]  }
 0x41e   : > { %v1555_v42 = vmax.f32 %v3161_v55, 0.0  ;;  %v1556_v21 = vmax.f32 %v3162_v57, 0.0  ;;  %v3157_v47 = vunpack.c.l.bf16 %v3256_v25  ;;  %v3158_v11 = vunpack.c.h.bf16 %v3256_v25  ;;  %v3244_v4 = vld [vmem:[#allocation3 + $0x8] sm:$0xff]   ;;  %v1753_v17 = vld [vmem:[%s709_s24] sm:$0x1]  ;;  %s4732_s24 = sld [smem:[#allocation28_spill]] }
 0x41f   : > { %v1566_v59 = vpack.c.bf16 %v1542_v13, %v1541_v16  ;;  %v1565_v60 = vpack.c.bf16 %v1540_v45, %v1539_v34  ;;  %v1537_v63 = vmax.f32 %v3125_v5, 0.0  ;;  %v1538_v44 = vmax.f32 %v3126_v7, 0.0  ;;  %v3104_v16 = vld [vmem:[#allocation3] sm:$0xff]  }
 0x420   : > { %v3258_v37 = vld [vmem:[#allocation3 + $0x78] sm:$0xff]   ;;  %v1573_v20 = vpack.c.bf16 %v1556_v21, %v1555_v42  ;;  %v3121_v31 = vunpack.c.l.bf16 %v3247_v52  ;;  %v3122_v49 = vunpack.c.h.bf16 %v3247_v52  ;;  %v1553_v0 = vmax.f32 %v3157_v47, 0.0 }
 0x421   : > { %v3165_v48 = vunpack.c.l.bf16 %v3258_v37  ;;  %v3166_v62 = vunpack.c.h.bf16 %v3258_v37  ;;  %1655 = vmatpush.bf16.msra.mxu0 %v1566_v59  ;;  %v1554_v41 = vmax.f32 %v3158_v11, 0.0  ;;  %v3153_v36 = vunpack.c.l.bf16 %v3255_v12  ;;  %v3252_v37 = vld [vmem:[#allocation3 + $0x48] sm:$0xff]  }
 0x422   : > { %v3154_v46 = vunpack.c.h.bf16 %v3255_v12  ;;  %v1564_v22 = vpack.c.bf16 %v1538_v44, %v1537_v63  ;;  %v1535_v29 = vmax.f32 %v3121_v31, 0.0  ;;  %v1536_v14 = vmax.f32 %v3122_v49, 0.0  ;;  %v2662_v31 = vld [vmem:[%s4104_s7] sm:$0xf] }
 0x423   : > { %v1557_v51 = vmax.f32 %v3165_v48, 0.0  ;;  %v1558_v27 = vmax.f32 %v3166_v62, 0.0  ;;  %v1572_v3 = vpack.c.bf16 %v1554_v41, %v1553_v0  ;;  %v1551_v28 = vmax.f32 %v3153_v36, 0.0  ;;  %v2880_v0 = vld [vmem:[%s4104_s7 + $0x4] sm:$0xf0] }
 0x424   : > { %v3117_v30 = vunpack.c.l.bf16 %v3246_v56  ;;  %v1552_v54 = vmax.f32 %v3154_v46, 0.0  ;;  %v3118_v33 = vunpack.c.h.bf16 %v3246_v56  ;;  %v3149_v8 = vunpack.c.l.bf16 %v3254_v43  ;;  %v2879_v41 = vld [vmem:[%s4104_s7 + $0x4] sm:$0xf]  ;;  %v2664_v36 = vld [vmem:[%s4104_s7 + $0x8] sm:$0xf0]  ;;  %s4733_s14 = sshll.u32 %s4732_s24, 7 }
 0x425   : > { %v1574_v58 = vpack.c.bf16 %v1558_v27, %v1557_v51  ;;  %1656 = vmatpush.bf16.msra.mxu0 %v1565_v60  ;;  %v3150_v39 = vunpack.c.h.bf16 %v3254_v43  ;;  %v3113_v40 = vunpack.c.l.bf16 %v3245_v23  ;;  %v3114_v61 = vunpack.c.h.bf16 %v3245_v23  ;;  %v3251_v51 = vld [vmem:[#allocation3 + $0x40] sm:$0xff]   ;;  %v2881_v23 = vld [vmem:[%s4104_s7 + $0x14] sm:$0xf]  ;;  %s4439_s25 = sshra.s32 %s4733_s14, 3  ;;  %p2144_p1 = scmp.eq.s32.totalorder %s4732_s24, 1 }
 0x426   : > { %v3145_v6 = vunpack.c.l.bf16 %v3253_v9  ;;  %v3146_v18 = vunpack.c.h.bf16 %v3253_v9  ;;  %v1563_v26 = vpack.c.bf16 %v1536_v14, %v1535_v29  ;;  %v1533_v2 = vmax.f32 %v3117_v30, 0.0  ;;  %v2882_v29 = vld [vmem:[%s4104_s7 + $0x14] sm:$0xf0]  ;;  %v2678_v30 = vld [vmem:[%s4104_s7 + $0x20] sm:$0xf]  ;;  %s2659_s2 = sshll.u32 %s4439_s25, 2 }
 0x427   : > { %1704 = vmatpush.bf16.msra.mxu1 %v1574_v58  ;;  %v1571_v19 = vpack.c.bf16 %v1552_v54, %v1551_v28  ;;  %v1534_v24 = vmax.f32 %v3118_v33, 0.0  ;;  %v1549_v32 = vmax.f32 %v3149_v8, 0.0  ;;  %v1550_v35 = vmax.f32 %v3150_v39, 0.0  ;;  %v2884_v9 = vld [vmem:[%s4104_s7 + $0x24] sm:$0xf0]  ;;  %s4446_s21 = scalar_lea.vmem [#allocation3], %s2659_s2  ;;  %p4519_p3 = pnand %p2144_p1, %p722_p4 }
 0x428   : > { %v1531_v38 = vmax.f32 %v3113_v40, 0.0  ;;  %v1532_v50 = vmax.f32 %v3114_v61, 0.0  ;;  %v1547_v53 = vmax.f32 %v3145_v6, 0.0  ;;  %v1548_v48 = vmax.f32 %v3146_v18, 0.0  ;;  %v2883_v54 = vld [vmem:[%s4104_s7 + $0x24] sm:$0xf] }
 0x429   : > { %1657 = vmatpush.bf16.msra.mxu0 %v1564_v22  ;;  %v3109_v62 = vunpack.c.l.bf16 %v3244_v4  ;;  %v3110_v1 = vunpack.c.h.bf16 %v3244_v4  ;;  %v3141_v10 = vunpack.c.l.bf16 %v3252_v37  ;;  %v1562_v55 = vpack.c.bf16 %v1534_v24, %v1533_v2  ;;  %v2670_v22 = vld [vmem:[%s4104_s7 + $0x10] sm:$0xf]  ;;  %v2680_v33 = vld [vmem:[%s4104_s7 + $0x28] sm:$0xf0]  ;;  %v2886_v61 = vld [vmem:[%s4104_s7 + $0x34] sm:$0xf0] }
 0x42a   : > { %v1570_v57 = vpack.c.bf16 %v1550_v35, %v1549_v32  ;;  %v3142_v15 = vunpack.c.h.bf16 %v3252_v37  ;;  %v1561_v13 = vpack.c.bf16 %v1532_v50, %v1531_v38  ;;  %v1569_v27 = vpack.c.bf16 %v1548_v48, %v1547_v53  ;;  %v2686_v40 = vld [vmem:[%s4104_s7 + $0x30] sm:$0xf]  ;;  %v2885_v6 = vld [vmem:[%s4104_s7 + $0x34] sm:$0xf]  ;;  %v2688_v18 = vld [vmem:[%s4104_s7 + $0x38] sm:$0xf0] }
 0x42b   : > { %1705 = vmatpush.bf16.msra.mxu1 %v1573_v20  ;;  %v1529_v25 = vmax.f32 %v3109_v62, 0.0  ;;  %v1754_v34 = vadd.f32 1.0, %v1753_v17  ;;  %v1530_v45 = vmax.f32 %v3110_v1, 0.0  ;;  %v1545_v42 = vmax.f32 %v3141_v10, 0.0  ;;  %v2694_v4 = vld [vmem:[%s4104_s7 + $0x40] sm:$0xf] }
 0x42c   : > { %v3105_v21 = vunpack.c.l.bf16 %v3104_v16  ;;  %v3106_v52 = vunpack.c.h.bf16 %v3104_v16  ;;  %v3816_v59 = vmov 0   ;;  %v1546_v58 = vmax.f32 %v3142_v15, 0.0  ;;  %v2887_v24 = vld [vmem:[%s4104_s7 + $0x44] sm:$0xf]  ;;  %v2696_v32 = vld [vmem:[%s4104_s7 + $0x48] sm:$0xf0] }
 0x42d   : > { %1658 = vmatpush.bf16.msra.mxu0 %v1563_v26  ;;  %3426 = vset.pattern.permute.xlu0 %v3816_v59  ;;  %v3137_v5 = vunpack.c.l.bf16 %v3251_v51  ;;  %v3138_v7 = vunpack.c.h.bf16 %v3251_v51  ;;  %v1772_v12 = vperm.slane %v1754_v34, 0  ;;  %v1560_v60 = vpack.c.bf16 %v1530_v45, %v1529_v25  ;;  %v2902_v38 = vld [vmem:[%s4119_s4 + $0x38] sm:$0xff]  ;;  %v2702_v50 = vld [vmem:[%s4104_s7 + $0x50] sm:$0xf]  ;;  %v2890_v53 = vld [vmem:[%s4104_s7 + $0x54] sm:$0xf0] }
 0x42e   : > { %v1527_v20 = vmax.f32 %v3105_v21, 0.0  ;;  %v1568_v47 = vpack.c.bf16 %v1546_v58, %v1545_v42  ;;  %v1528_v11 = vmax.f32 %v3106_v52, 0.0  ;;  %v2663_v46 = vor.u32 %v2880_v0, %v2662_v31  ;;  %1885 = vmatpush.bf16.msra.mxu2 %v2902_v38  ;;  %v2889_v48 = vld [vmem:[%s4104_s7 + $0x54] sm:$0xf]  ;;  %v2704_v62 = vld [vmem:[%s4104_s7 + $0x58] sm:$0xf0] }
 0x42f   : > { %1706 = vmatpush.bf16.msra.mxu1 %v1572_v3  ;;  %1774 = vperm.xlu0 %3426, %v1772_v12   ;;  %v1543_v63 = vmax.f32 %v3137_v5, 0.0  ;;  %v1544_v44 = vmax.f32 %v3138_v7, 0.0  ;;  %v2667_v43 = vor.u32 %v2879_v41, %v2664_v36  ;;  %v2672_v3 = vld [vmem:[%s4104_s7 + $0x18] sm:$0xf0]  ;;  %v2671_v14 = vor.u32 %v2882_v29, %v2670_v22  ;;  %v2710_v15 = vld [vmem:[%s4104_s7 + $0x60] sm:$0xf] }
 0x430   : > { %v1559_v49 = vpack.c.bf16 %v1528_v11, %v1527_v20  ;;  %v2675_v28 = vor.u32 %v2881_v23, %v2672_v3  ;;  %v2679_v8 = vor.u32 %v2884_v9, %v2678_v30  ;;  %v2683_v39 = vor.u32 %v2883_v54, %v2680_v33  ;;  %v2901_v17 = vld [vmem:[%s4119_s4 + $0x30] sm:$0xff]  ;;  %v2892_v16 = vld [vmem:[%s4104_s7 + $0x64] sm:$0xf0]  ;;  %v2712_v51 = vld [vmem:[%s4104_s7 + $0x68] sm:$0xf0]  ;;  %s4544_s0 = scalar_lea.vmem [#allocation2], %s2659_s2 }
 0x431   : > { %1659 = vmatpush.bf16.msra.mxu0 %v1562_v55  ;;  %v1567_v56 = vpack.c.bf16 %v1544_v44, %v1543_v63  ;;  %v2687_v26 = vor.u32 %v2886_v61, %v2686_v40  ;;  %v2691_v2 = vor.u32 %v2885_v6, %v2688_v18  ;;  %v2699_v37 = vor.u32 %v2887_v24, %v2696_v32  ;;  %v2900_v55 = vld [vmem:[%s4119_s4 + $0x28] sm:$0xff]  ;;  %v2897_v45 = vld [vmem:[%s4119_s4 + $0x10] sm:$0xff]  ;;  %v3242_v58 = vld [vmem:[%s4446_s21 + $0x30] sm:$0xff]  }
 0x432   : > { %v2703_v1 = vor.u32 %v2890_v53, %v2702_v50  ;;  %v2707_v10 = vor.u32 %v2889_v48, %v2704_v62  ;;  %1886 = vmatpush.bf16.msra.mxu2 %v2901_v17  ;;  %v2711_v25 = vor.u32 %v2892_v16, %v2710_v15  ;;  %v2896_v42 = vld [vmem:[%s4119_s4 + $0x8] sm:$0xff]  ;;  %v3241_v59 = vld [vmem:[%s4446_s21 + $0x28] sm:$0xff]   ;;  %v3243_v5 = vld [vmem:[%s4446_s21 + $0x38] sm:$0xff]   ;;  %v3098_v0 = vunpack.c.h.bf16 %v3242_v58 }
 0x433   : > { %1707 = vmatpush.bf16.msra.mxu1 %v1571_v19  ;;  %v2888_v19 = vld [vmem:[%s4104_s7 + $0x44] sm:$0xf0]  ;;  %v3240_v21 = vld [vmem:[%s4446_s21 + $0x20] sm:$0xff]   ;;  %v3093_v11 = vunpack.c.l.bf16 %v3241_v59  ;;  %v3094_v63 = vunpack.c.h.bf16 %v3241_v59  ;;  %v2894_v44 = vld [vmem:[%s4104_s7 + $0x74] sm:$0xf0]  ;;  %v3101_v41 = vunpack.c.l.bf16 %v3243_v5  ;;  %v3102_v36 = vunpack.c.h.bf16 %v3243_v5 }
 0x434   : > { %v2695_v35 = vor.u32 %v2888_v19, %v2694_v4  ;;  %v3089_v52 = vunpack.c.l.bf16 %v3240_v21  ;;  %v2895_v12 = vld [vmem:[%s4119_s4] sm:$0xff]  ;;  %v2893_v31 = vld [vmem:[%s4104_s7 + $0x74] sm:$0xf] }
 0x435   : > { %1660 = vmatpush.bf16.msra.mxu0 %v1561_v13  ;;  %v2891_v13 = vld [vmem:[%s4104_s7 + $0x64] sm:$0xf]  ;;  %v3072_v54 = vld [vmem:[%s4446_s21] sm:$0xff]  }
 0x436   : > { %1887 = vmatpush.bf16.msra.mxu2 %v2900_v55  ;;  %v2715_v34 = vor.u32 %v2891_v13, %v2712_v51  ;;  %v3238_v51 = vld [vmem:[%s4446_s21 + $0x10] sm:$0xff]  }
 0x437   : > { %1708 = vmatpush.bf16.msra.mxu1 %v1570_v57  ;;  %v2899_v57 = vld [vmem:[%s4119_s4 + $0x20] sm:$0xff] }
 0x439   : > { %1661 = vmatpush.bf16.msra.mxu0 %v1560_v60  ;;  %v2718_v60 = vld [vmem:[%s4104_s7 + $0x70] sm:$0xf] }
 0x43a   : > { %1888 = vmatpush.bf16.msra.mxu2 %v2899_v57 }
 0x43b   : > { %1709 = vmatpush.bf16.msra.mxu1 %v1569_v27  ;;  %v2898_v27 = vld [vmem:[%s4119_s4 + $0x18] sm:$0xff] }
 0x43d   : > { %1662 = vmatpush.bf16.msra.mxu0 %v1559_v49  ;;  %v2720_v49 = vld [vmem:[%s4104_s7 + $0x78] sm:$0xf0] }
 0x43e   : > { %1889 = vmatpush.bf16.msra.mxu2 %v2898_v27  ;;  %v2723_v30 = vor.u32 %v2893_v31, %v2720_v49  ;;  %v3081_v27 = vunpack.c.l.bf16 %v3238_v51 }
 0x43f   : > { %1710 = vmatpush.bf16.msra.mxu1 %v1568_v47  ;;  %v3090_v47 = vunpack.c.h.bf16 %v3240_v21 }
 0x440   : > { %1663 = vmatmul.bf16.vlgmr.msra.gmra.mxu0 %v2663_v46 }
 0x442   : > { %1890 = vmatpush.bf16.msra.mxu2 %v2897_v45 }
 0x443   : > { %1711 = vmatpush.bf16.msra.mxu1 %v1567_v56  ;;  %v3097_v56 = vunpack.c.l.bf16 %v3242_v58 }
 0x446   : > { %1712 = vmatmul.bf16.vlgmr.msra.gmra.mxu1 %v2667_v43  ;;  %1891 = vmatpush.bf16.msra.mxu2 %v2896_v42 }
 0x44a   : > { %1892 = vmatpush.bf16.msra.mxu2 %v2895_v12 }
 0x450   : > { %1668 = vmatmul.bf16.gmra.mxu0 %v2671_v14 }
 0x456   : > { %1717 = vmatmul.bf16.gmra.mxu1 %v2675_v28  ;;  %v2719_v28 = vor.u32 %v2894_v44, %v2718_v60 }
 0x460   : > { %1673 = vmatmul.bf16.gmra.mxu0 %v2679_v8  ;;  %v3073_v8 = vunpack.c.l.bf16 %v3072_v54 }
 0x466   : > { %1722 = vmatmul.bf16.gmra.mxu1 %v2683_v39  ;;  %v3074_v39 = vunpack.c.h.bf16 %v3072_v54 }
 0x470   : > { %1678 = vmatmul.bf16.gmra.mxu0 %v2687_v26 }
 0x476   : > { %1727 = vmatmul.bf16.gmra.mxu1 %v2691_v2 }
 0x480   : > { %1683 = vmatmul.bf16.gmra.mxu0 %v2695_v35 }
 0x486   : > { %1732 = vmatmul.bf16.gmra.mxu1 %v2699_v37  ;;  %v3237_v37 = vld [vmem:[%s4446_s21 + $0x8] sm:$0xff]  }
 0x487   : > { %v3077_v38 = vunpack.c.l.bf16 %v3237_v37  ;;  %v3078_v50 = vunpack.c.h.bf16 %v3237_v37 }
 0x490   : > { %1688 = vmatmul.bf16.gmra.mxu0 %v2703_v1 }
 0x496   : > { %1737 = vmatmul.bf16.gmra.mxu1 %v2707_v10 }
 0x4a0   : > { %1693 = vmatmul.bf16.gmra.mxu0 %v2711_v25  ;;  %v3082_v25 = vunpack.c.h.bf16 %v3238_v51  ;;  %v2905_v51 = vld [vmem:[%s4125_s22 + $0x10] sm:$0xff] }
 0x4a1   : > { %v4452_v7 = vpop.permute.xlu0 %1774 }
 0x4a2   : > { %v4457_v20 = vmul.f32 %v3089_v52, %v4452_v7  ;;  %v4463_v46 = vmul.f32 %v3090_v47, %v4452_v7  ;;  %v4466_v43 = vmul.f32 %v3093_v11, %v4452_v7  ;;  %v4469_v22 = vmul.f32 %v3094_v63, %v4452_v7  ;;  %v3239_v11 = vld [vmem:[%s4446_s21 + $0x18] sm:$0xff]  }
 0x4a3   : > { %v4472_v29 = vmul.f32 %v3097_v56, %v4452_v7  ;;  %v4475_v23 = vmul.f32 %v3098_v0, %v4452_v7  ;;  %v4478_v3 = vmul.f32 %v3101_v41, %v4452_v7  ;;  %v4481_v14 = vmul.f32 %v3102_v36, %v4452_v7 }
 0x4a4   : > { %v1777_v61 = vmul.f32 %v3073_v8, %v4452_v7  ;;  %v1778_v6 = vmul.f32 %v3074_v39, %v4452_v7  ;;  %v1779_v1 = vmul.f32 %v3077_v38, %v4452_v7  ;;  %v1780_v17 = vmul.f32 %v3078_v50, %v4452_v7 }
 0x4a5   : > { %v1781_v21 = vmul.f32 %v3081_v27, %v4452_v7  ;;  %v1782_v59 = vmul.f32 %v3082_v25, %v4452_v7  ;;  %v3085_v63 = vunpack.c.l.bf16 %v3239_v11  ;;  %v3086_v44 = vunpack.c.h.bf16 %v3239_v11 }
 0x4a6   : > { %1742 = vmatmul.bf16.gmra.mxu1 %v2715_v34 }
 0x4a7   : > { %v1783_v0 = vmul.f32 %v3085_v63, %v4452_v7  ;;  %v1784_v36 = vmul.f32 %v3086_v44, %v4452_v7 }
 0x4b0   : > { %1698 = vmatmul.bf16.gmra.mxu0 %v2719_v28 }
 0x4b6   : > { %1747 = vmatmul.bf16.gmra.mxu1 %v2723_v30 }
 0x4bd   : > { %v1664_v9 = vpop.f32.mrf.mxu0 }
 0x4c3   : > { %v1713_v33 = vpop.f32.mrf.mxu1 }
 0x4c4   : > { %v1714_v40 = vadd.f32 %v1713_v33, %v1664_v9 }
 0x4c5   : > { %v1666_v18 = vpop.f32.mrf.mxu0 }
 0x4c6   : > { %v1793_v4 = vadd.f32 %v1777_v61, %v1714_v40 }
 0x4cb   : > { %v1715_v26 = vpop.f32.mrf.mxu1 }
 0x4cc   : > { %v1716_v2 = vadd.f32 %v1715_v26, %v1666_v18 }
 0x4cd   : > { %v1669_v32 = vpop.f32.mrf.mxu0 }
 0x4ce   : > { %v1794_v19 = vadd.f32 %v1778_v6, %v1716_v2 }
 0x4d0   : > { %v1809_v24 = vpack.c.bf16 %v1794_v19, %v1793_v4 }
 0x4d2   : > { %1893 = vmatmul.bf16.vlgmr.msra.gmra.mxu2 %v1809_v24 }
 0x4d3   : > { %v1718_v35 = vpop.f32.mrf.mxu1 }
 0x4d4   : > { %v1719_v53 = vadd.f32 %v1718_v35, %v1669_v32 }
 0x4d5   : > { %v1671_v48 = vpop.f32.mrf.mxu0 }
 0x4d6   : > { %v1795_v55 = vadd.f32 %v1779_v1, %v1719_v53  ;;  %v2909_v53 = vld [vmem:[%s4125_s22 + $0x30] sm:$0xff] }
 0x4db   : > { %v1720_v62 = vpop.f32.mrf.mxu1 }
 0x4dc   : > { %v1721_v10 = vadd.f32 %v1720_v62, %v1671_v48  ;;  %v2908_v48 = vld [vmem:[%s4125_s22 + $0x28] sm:$0xff] }
 0x4dd   : > { %v1674_v16 = vpop.f32.mrf.mxu0 }
 0x4de   : > { %v1796_v57 = vadd.f32 %v1780_v17, %v1721_v10 }
 0x4e0   : > { %v1810_v15 = vpack.c.bf16 %v1796_v57, %v1795_v55 }
 0x4e2   : > { %1898 = vmatmul.bf16.gmra.mxu2 %v1810_v15 }
 0x4e3   : > { %v1723_v13 = vpop.f32.mrf.mxu1 }
 0x4e4   : > { %v1724_v34 = vadd.f32 %v1723_v13, %v1674_v16  ;;  %v2906_v13 = vld [vmem:[%s4125_s22 + $0x18] sm:$0xff] }
 0x4e5   : > { %v1676_v45 = vpop.f32.mrf.mxu0 }
 0x4e6   : > { %v1797_v58 = vadd.f32 %v1781_v21, %v1724_v34  ;;  %v2903_v21 = vld [vmem:[%s4125_s22] sm:$0xff] }
 0x4eb   : > { %v1725_v42 = vpop.f32.mrf.mxu1 }
 0x4ec   : > { %v1726_v52 = vadd.f32 %v1725_v42, %v1676_v45  ;;  %v2904_v45 = vld [vmem:[%s4125_s22 + $0x8] sm:$0xff] }
 0x4ed   : > { %v1679_v60 = vpop.f32.mrf.mxu0 }
 0x4ee   : > { %v1798_v5 = vadd.f32 %v1782_v59, %v1726_v52 }
 0x4f0   : > { %v1811_v12 = vpack.c.bf16 %v1798_v5, %v1797_v58  ;;  %v3427_v58 = vld [vmem:[%s713_s1] ss:$0 sm:$0xff] }
 0x4f2   : > { %1903 = vmatmul.bf16.gmra.mxu2 %v1811_v12 }
 0x4f3   : > { %v1728_v47 = vpop.f32.mrf.mxu1 }
 0x4f4   : > { %v1729_v31 = vadd.f32 %v1728_v47, %v1679_v60 }
 0x4f5   : > { %v1681_v49 = vpop.f32.mrf.mxu0 }
 0x4f6   : > { %v1799_v28 = vadd.f32 %v1783_v0, %v1729_v31 }
 0x4fb   : > { %v1730_v56 = vpop.f32.mrf.mxu1 }
 0x4fc   : > { %v1731_v41 = vadd.f32 %v1730_v56, %v1681_v49 }
 0x4fd   : > { %v1684_v54 = vpop.f32.mrf.mxu0 }
 0x4fe   : > { %v1800_v30 = vadd.f32 %v1784_v36, %v1731_v41 }
 0x500   : > { %v1812_v9 = vpack.c.bf16 %v1800_v30, %v1799_v28 }
 0x502   : > { %1908 = vmatmul.bf16.gmra.mxu2 %v1812_v9 }
 0x503   : > { %v1733_v33 = vpop.f32.mrf.mxu1 }
 0x504   : > { %v1734_v8 = vadd.f32 %v1733_v33, %v1684_v54 }
 0x505   : > { %v1686_v39 = vpop.f32.mrf.mxu0 }
 0x506   : > { %v1801_v6 = vadd.f32 %v4457_v20, %v1734_v8  ;;  %v2910_v20 = vld [vmem:[%s4125_s22 + $0x38] sm:$0xff] }
 0x507   : > { %2026 = vmatpush.bf16.msra.mxu3 %v2910_v20 }
 0x50b   : > { %v1735_v40 = vpop.f32.mrf.mxu1  ;;  %2027 = vmatpush.bf16.msra.mxu3 %v2909_v53 }
 0x50c   : > { %v1736_v61 = vadd.f32 %v1735_v40, %v1686_v39 }
 0x50d   : > { %v1689_v2 = vpop.f32.mrf.mxu0 }
 0x50e   : > { %v1802_v18 = vadd.f32 %v4463_v46, %v1736_v61 }
 0x50f   : > { %2028 = vmatpush.bf16.msra.mxu3 %v2908_v48 }
 0x510   : > { %v1813_v26 = vpack.c.bf16 %v1802_v18, %v1801_v6 }
 0x512   : > { %1913 = vmatmul.bf16.gmra.mxu2 %v1813_v26 }
 0x513   : > { %v1738_v7 = vpop.f32.mrf.mxu1 }
 0x514   : > { %v1739_v4 = vadd.f32 %v1738_v7, %v1689_v2 }
 0x515   : > { %v1691_v19 = vpop.f32.mrf.mxu0 }
 0x516   : > { %v1803_v35 = vadd.f32 %v4466_v43, %v1739_v4  ;;  %v2907_v43 = vld [vmem:[%s4125_s22 + $0x20] sm:$0xff] }
 0x517   : > { %2029 = vmatpush.bf16.msra.mxu3 %v2907_v43 }
 0x51b   : > { %v1740_v24 = vpop.f32.mrf.mxu1  ;;  %2030 = vmatpush.bf16.msra.mxu3 %v2906_v13 }
 0x51c   : > { %v1741_v32 = vadd.f32 %v1740_v24, %v1691_v19 }
 0x51d   : > { %v1694_v50 = vpop.f32.mrf.mxu0 }
 0x51e   : > { %v1804_v37 = vadd.f32 %v4469_v22, %v1741_v32 }
 0x51f   : > { %2031 = vmatpush.bf16.msra.mxu3 %v2905_v51 }
 0x520   : > { %v1814_v38 = vpack.c.bf16 %v1804_v37, %v1803_v35 }
 0x522   : > { %1918 = vmatmul.bf16.gmra.mxu2 %v1814_v38 }
 0x523   : > { %v1743_v46 = vpop.f32.mrf.mxu1  ;;  %2032 = vmatpush.bf16.msra.mxu3 %v2904_v45  ;;  %v4528_v45 = vld [vmem:[%s716_s18] ss:$0 sm:$0xff] }
 0x524   : > { %v1744_v62 = vadd.f32 %v1743_v46, %v1694_v50 }
 0x525   : > { %v1696_v1 = vpop.f32.mrf.mxu0 }
 0x526   : > { %v1805_v22 = vadd.f32 %v4472_v29, %v1744_v62 }
 0x527   : > { %2033 = vmatpush.bf16.msra.mxu3 %v2903_v21 }
 0x52b   : > { %v1745_v10 = vpop.f32.mrf.mxu1 }
 0x52c   : > { %v1746_v17 = vadd.f32 %v1745_v10, %v1696_v1 }
 0x52d   : > { %v1699_v15 = vpop.f32.mrf.mxu0 }
 0x52e   : > { %v1806_v55 = vadd.f32 %v4475_v23, %v1746_v17 }
 0x530   : > { %v1815_v57 = vpack.c.bf16 %v1806_v55, %v1805_v22 }
 0x532   : > { %1923 = vmatmul.bf16.gmra.mxu2 %v1815_v57 }
 0x533   : > { %v1748_v16 = vpop.f32.mrf.mxu1 }
 0x534   : > { %v1749_v27 = vadd.f32 %v1748_v16, %v1699_v15 }
 0x535   : > { %v1701_v25 = vpop.f32.mrf.mxu0 }
 0x536   : > { %v1807_v29 = vadd.f32 %v4478_v3, %v1749_v27 }
 0x53b   : > { %v1750_v34 = vpop.f32.mrf.mxu1 }
 0x53c   : > { %v1751_v42 = vadd.f32 %v1750_v34, %v1701_v25 }
 0x53e   : > { %v1808_v23 = vadd.f32 %v4481_v14, %v1751_v42 }
 0x540   : > { %v1816_v52 = vpack.c.bf16 %v1808_v23, %v1807_v29  ;;  %v2092_v29 = vstv %s2091_s3 }
 0x541   : > { %vm4534_vm2 = vcmp.eq.s32.totalorder %v2092_v29, 1 }
 0x542   : > { %1928 = vmatmul.bf16.gmra.mxu2 %v1816_v52 }
 0x555   : > { %v1894_v59 = vpop.f32.mrf.mxu2 }
 0x556   : > { %v1895_v5 = vadd.f32 %v3427_v58, %v1894_v59 }
 0x558   : > { %v1934_v47 = vmax.f32 %v1895_v5, 0.0 }
 0x55d   : > { %v1896_v12 = vpop.f32.mrf.mxu2 }
 0x55e   : > { %v1897_v60 = vadd.f32 %v3427_v58, %v1896_v12 }
 0x560   : > { %v1935_v11 = vmax.f32 %v1897_v60, 0.0 }
 0x562   : > { %v1950_v63 = vpack.c.bf16 %v1935_v11, %v1934_v47 }
 0x564   : > { %2034 = vmatmul.bf16.vlgmr.msra.gmra.mxu3 %v1950_v63 }
 0x565   : > { %v1899_v3 = vpop.f32.mrf.mxu2 }
 0x566   : > { %v1900_v44 = vadd.f32 %v3427_v58, %v1899_v3 }
 0x568   : > { %v1936_v49 = vmax.f32 %v1900_v44, 0.0 }
 0x56d   : > { %v1901_v14 = vpop.f32.mrf.mxu2 }
 0x56e   : > { %v1902_v31 = vadd.f32 %v3427_v58, %v1901_v14 }
 0x570   : > { %v1937_v56 = vmax.f32 %v1902_v31, 0.0 }
 0x572   : > { %v1951_v0 = vpack.c.bf16 %v1937_v56, %v1936_v49 }
 0x574   : > { %2039 = vmatmul.bf16.gmra.mxu3 %v1951_v0 }
 0x575   : > { %v1904_v41 = vpop.f32.mrf.mxu2 }
 0x576   : > { %v1905_v36 = vadd.f32 %v3427_v58, %v1904_v41 }
 0x578   : > { %v1938_v9 = vmax.f32 %v1905_v36, 0.0 }
 0x57d   : > { %v1906_v28 = vpop.f32.mrf.mxu2 }
 0x57e   : > { %v1907_v30 = vadd.f32 %v3427_v58, %v1906_v28 }
 0x580   : > { %v1939_v54 = vmax.f32 %v1907_v30, 0.0 }
 0x582   : > { %v1952_v33 = vpack.c.bf16 %v1939_v54, %v1938_v9 }
 0x584   : > { %2044 = vmatmul.bf16.gmra.mxu3 %v1952_v33 }
 0x585   : > { %v1909_v8 = vpop.f32.mrf.mxu2 }
 0x586   : > { %v1910_v39 = vadd.f32 %v3427_v58, %v1909_v8 }
 0x588   : > { %v1940_v6 = vmax.f32 %v1910_v39, 0.0 }
 0x58d   : > { %v1911_v40 = vpop.f32.mrf.mxu2 }
 0x58e   : > { %v1912_v61 = vadd.f32 %v3427_v58, %v1911_v40 }
 0x590   : > { %v1941_v18 = vmax.f32 %v1912_v61, 0.0 }
 0x592   : > { %v1953_v26 = vpack.c.bf16 %v1941_v18, %v1940_v6 }
 0x594   : > { %2049 = vmatmul.bf16.gmra.mxu3 %v1953_v26 }
 0x595   : > { %v1914_v2 = vpop.f32.mrf.mxu2 }
 0x596   : > { %v1915_v7 = vadd.f32 %v3427_v58, %v1914_v2 }
 0x598   : > { %v1942_v24 = vmax.f32 %v1915_v7, 0.0 }
 0x59d   : > { %v1916_v4 = vpop.f32.mrf.mxu2 }
 0x59e   : > { %v1917_v19 = vadd.f32 %v3427_v58, %v1916_v4 }
 0x5a0   : > { %v1943_v32 = vmax.f32 %v1917_v19, 0.0 }
 0x5a2   : > { %v1954_v35 = vpack.c.bf16 %v1943_v32, %v1942_v24 }
 0x5a4   : > { %2054 = vmatmul.bf16.gmra.mxu3 %v1954_v35 }
 0x5a5   : > { %v1919_v37 = vpop.f32.mrf.mxu2 }
 0x5a6   : > { %v1920_v38 = vadd.f32 %v3427_v58, %v1919_v37 }
 0x5a8   : > { %v1944_v46 = vmax.f32 %v1920_v38, 0.0 }
 0x5ad   : > { %v1921_v20 = vpop.f32.mrf.mxu2 }
 0x5ae   : > { %v1922_v50 = vadd.f32 %v3427_v58, %v1921_v20 }
 0x5b0   : > { %v1945_v53 = vmax.f32 %v1922_v50, 0.0 }
 0x5b2   : > { %v1955_v48 = vpack.c.bf16 %v1945_v53, %v1944_v46 }
 0x5b4   : > { %2059 = vmatmul.bf16.gmra.mxu3 %v1955_v48 }
 0x5b5   : > { %v1924_v62 = vpop.f32.mrf.mxu2 }
 0x5b6   : > { %v1925_v1 = vadd.f32 %v3427_v58, %v1924_v62 }
 0x5b8   : > { %v1946_v43 = vmax.f32 %v1925_v1, 0.0 }
 0x5bd   : > { %v1926_v10 = vpop.f32.mrf.mxu2 }
 0x5be   : > { %v1927_v17 = vadd.f32 %v3427_v58, %v1926_v10 }
 0x5c0   : > { %v1947_v22 = vmax.f32 %v1927_v17, 0.0 }
 0x5c2   : > { %v1956_v55 = vpack.c.bf16 %v1947_v22, %v1946_v43 }
 0x5c4   : > { %2064 = vmatmul.bf16.gmra.mxu3 %v1956_v55 }
 0x5c5   : > { %v1929_v57 = vpop.f32.mrf.mxu2 }
 0x5c6   : > { %v1930_v15 = vadd.f32 %v3427_v58, %v1929_v57 }
 0x5c8   : > { %v1948_v51 = vmax.f32 %v1930_v15, 0.0 }
 0x5cd   : > { %v1931_v16 = vpop.f32.mrf.mxu2 }
 0x5ce   : > { %v1932_v13 = vadd.f32 %v3427_v58, %v1931_v16 }
 0x5d0   : > { %v1949_v27 = vmax.f32 %v1932_v13, 0.0 }
 0x5d2   : > { %v1957_v25 = vpack.c.bf16 %v1949_v27, %v1948_v51 }
 0x5d4   : > { %2069 = vmatmul.bf16.gmra.mxu3 %v1957_v25 }
 0x5e7   : > { %v2035_v34 = vpop.f32.mrf.mxu3 }
 0x5e8   : > { %v2036_v42 = vadd.f32 %v4528_v45, %v2035_v34 }
 0x5ea   : > { %v2075_v21 = vmax.f32 %v2036_v42, 0.0 }
 0x5ec   : > { %v2094_v5 = vsel %vm4534_vm2, %v2036_v42, %v2075_v21 }
 0x5ef   : > { %v2037_v23 = vpop.f32.mrf.mxu3 }
 0x5f0   : > { %v2038_v52 = vadd.f32 %v4528_v45, %v2037_v23 }
 0x5f2   : > { %v2076_v58 = vmax.f32 %v2038_v52, 0.0 }
 0x5f4   : > { %v2095_v12 = vsel %vm4534_vm2, %v2038_v52, %v2076_v58 }
 0x5f5   : > { %v3170_v60 = vpack.c.bf16 %v2095_v12, %v2094_v5 }
 0x5f7   : > { %3171 = vst [vmem:[%s4544_s0] sm:$0xff] %v3170_v60   ;;  %v2040_v47 = vpop.f32.mrf.mxu3 }
 0x5f8   : > { %v2041_v11 = vadd.f32 %v4528_v45, %v2040_v47 }
 0x5fa   : > { %v2077_v3 = vmax.f32 %v2041_v11, 0.0 }
 0x5fc   : > { %v2096_v31 = vsel %vm4534_vm2, %v2041_v11, %v2077_v3 }
 0x5ff   : > { %v2042_v63 = vpop.f32.mrf.mxu3 }
 0x600   : > { %v2043_v44 = vadd.f32 %v4528_v45, %v2042_v63 }
 0x602   : > { %v2078_v14 = vmax.f32 %v2043_v44, 0.0 }
 0x604   : > { %v2097_v49 = vsel %vm4534_vm2, %v2043_v44, %v2078_v14 }
 0x605   : > { %v3175_v56 = vpack.c.bf16 %v2097_v49, %v2096_v31 }
 0x607   : > { %3259 = vst [vmem:[%s4544_s0 + $0x8] sm:$0xff] %v3175_v56   ;;  %v2045_v0 = vpop.f32.mrf.mxu3 }
 0x608   : > { %v2046_v41 = vadd.f32 %v4528_v45, %v2045_v0 }
 0x60a   : > { %v2079_v28 = vmax.f32 %v2046_v41, 0.0 }
 0x60c   : > { %v2098_v54 = vsel %vm4534_vm2, %v2046_v41, %v2079_v28 }
 0x60f   : > { %v2047_v36 = vpop.f32.mrf.mxu3 }
 0x610   : > { %v2048_v30 = vadd.f32 %v4528_v45, %v2047_v36 }
 0x612   : > { %v2080_v9 = vmax.f32 %v2048_v30, 0.0 }
 0x614   : > { %v2099_v33 = vsel %vm4534_vm2, %v2048_v30, %v2080_v9 }
 0x615   : > { %v3180_v8 = vpack.c.bf16 %v2099_v33, %v2098_v54 }
 0x617   : > { %3260 = vst [vmem:[%s4544_s0 + $0x10] sm:$0xff] %v3180_v8   ;;  %v2050_v39 = vpop.f32.mrf.mxu3 }
 0x618   : > { %v2051_v40 = vadd.f32 %v4528_v45, %v2050_v39 }
 0x61a   : > { %v2081_v6 = vmax.f32 %v2051_v40, 0.0 }
 0x61c   : > { %v2100_v2 = vsel %vm4534_vm2, %v2051_v40, %v2081_v6 }
 0x61f   : > { %v2052_v61 = vpop.f32.mrf.mxu3 }
 0x620   : > { %v2053_v18 = vadd.f32 %v4528_v45, %v2052_v61 }
 0x622   : > { %v2082_v26 = vmax.f32 %v2053_v18, 0.0 }
 0x624   : > { %v2101_v7 = vsel %vm4534_vm2, %v2053_v18, %v2082_v26 }
 0x625   : > { %v3185_v4 = vpack.c.bf16 %v2101_v7, %v2100_v2 }
 0x627   : > { %3261 = vst [vmem:[%s4544_s0 + $0x18] sm:$0xff] %v3185_v4   ;;  %v2055_v19 = vpop.f32.mrf.mxu3 }
 0x628   : > { %v2056_v24 = vadd.f32 %v4528_v45, %v2055_v19 }
 0x62a   : > { %v2083_v35 = vmax.f32 %v2056_v24, 0.0 }
 0x62c   : > { %v2102_v20 = vsel %vm4534_vm2, %v2056_v24, %v2083_v35 }
 0x62f   : > { %v2057_v32 = vpop.f32.mrf.mxu3 }
 0x630   : > { %v2058_v37 = vadd.f32 %v4528_v45, %v2057_v32 }
 0x632   : > { %v2084_v38 = vmax.f32 %v2058_v37, 0.0 }
 0x634   : > { %v2103_v50 = vsel %vm4534_vm2, %v2058_v37, %v2084_v38 }
 0x635   : > { %v3190_v46 = vpack.c.bf16 %v2103_v50, %v2102_v20 }
 0x637   : > { %3262 = vst [vmem:[%s4544_s0 + $0x20] sm:$0xff] %v3190_v46   ;;  %v2060_v53 = vpop.f32.mrf.mxu3 }
 0x638   : > { %v2061_v48 = vadd.f32 %v4528_v45, %v2060_v53 }
 0x63a   : > { %v2085_v1 = vmax.f32 %v2061_v48, 0.0 }
 0x63c   : > { %v2104_v43 = vsel %vm4534_vm2, %v2061_v48, %v2085_v1 }
 0x63f   : > { %v2062_v62 = vpop.f32.mrf.mxu3 }
 0x640   : > { %v2063_v10 = vadd.f32 %v4528_v45, %v2062_v62 }
 0x642   : > { %v2086_v17 = vmax.f32 %v2063_v10, 0.0 }
 0x644   : > { %v2105_v22 = vsel %vm4534_vm2, %v2063_v10, %v2086_v17 }
 0x645   : > { %v3195_v55 = vpack.c.bf16 %v2105_v22, %v2104_v43 }
 0x647   : > { %3263 = vst [vmem:[%s4544_s0 + $0x28] sm:$0xff] %v3195_v55   ;;  %v2065_v57 = vpop.f32.mrf.mxu3 }
 0x648   : > { %v2066_v15 = vadd.f32 %v4528_v45, %v2065_v57 }
 0x64a   : > { %v2087_v13 = vmax.f32 %v2066_v15, 0.0 }
 0x64c   : > { %v2106_v25 = vsel %vm4534_vm2, %v2066_v15, %v2087_v13 }
 0x64f   : > { %v2067_v16 = vpop.f32.mrf.mxu3 }
 0x650   : > { %v2068_v51 = vadd.f32 %v4528_v45, %v2067_v16 }
 0x652   : > { %v2088_v27 = vmax.f32 %v2068_v51, 0.0 }
 0x654   : > { %v2107_v34 = vsel %vm4534_vm2, %v2068_v51, %v2088_v27 }
 0x655   : > { %v3200_v42 = vpack.c.bf16 %v2107_v34, %v2106_v25 }
 0x657   : > { %3264 = vst [vmem:[%s4544_s0 + $0x30] sm:$0xff] %v3200_v42   ;;  %v2070_v29 = vpop.f32.mrf.mxu3 }
 0x658   : > { %v2071_v23 = vadd.f32 %v4528_v45, %v2070_v29 }
 0x65a   : > { %v2089_v52 = vmax.f32 %v2071_v23, 0.0 }
 0x65c   : > { %v2108_v12 = vsel %vm4534_vm2, %v2071_v23, %v2089_v52 }
 0x65f   : > { %v2072_v21 = vpop.f32.mrf.mxu3 }
 0x660   : > { %v2073_v58 = vadd.f32 %v4528_v45, %v2072_v21 }
 0x662   : > { %v2090_v5 = vmax.f32 %v2073_v58, 0.0 }
 0x663   : > { %2148 = sbr.rel (%p4519_p3) target bundleno = 1813 (0x715), region = 116 }
 0x664   : > { %v2109_v60 = vsel %vm4534_vm2, %v2073_v58, %v2090_v5 }
 0x665   : > { %v3205_v47 = vpack.c.bf16 %v2109_v60, %v2108_v12 }
 0x667   : > { %3265 = vst [vmem:[%s4544_s0 + $0x38] sm:$0xff] %v3205_v47  }
 0x668   : > { %v2149_v30 = vld [vmem:[#allocation8] sm:$0xff] }
 0x669   : > { %v2183_v9 = vunpack.c.l.b16 %v2149_v30  ;;  %v2184_v54 = vunpack.c.h.b16 %v2149_v30 }
 0x66b   : > { %v2185_v39 = vpack.c.b16 %v2183_v9, %v2183_v9  ;;  %v2186_v40 = vpack.c.b16 %v2184_v54, %v2184_v54 }
 0x66e   : > { %v2918_v11 = vld [vmem:[#allocation2 + $0x38] sm:$0xff]  ;;  %v2917_v3 = vld [vmem:[#allocation2 + $0x30] sm:$0xff]  ;;  %v2916_v45 = vld [vmem:[#allocation2 + $0x28] sm:$0xff] }
 0x66f   : > { %v2926_v63 = vld [vmem:[#allocation2 + $0x78] sm:$0xff]  ;;  %2285 = vmatpush.bf16.msra.mxu0 %v2918_v11  ;;  %v2925_v44 = vld [vmem:[#allocation2 + $0x70] sm:$0xff]  ;;  %v2924_v14 = vld [vmem:[#allocation2 + $0x68] sm:$0xff] }
 0x670   : > { %2298 = vmatpush.bf16.msra.mxu1 %v2926_v63  ;;  %v2915_v31 = vld [vmem:[#allocation2 + $0x20] sm:$0xff]  ;;  %v2914_v49 = vld [vmem:[#allocation2 + $0x18] sm:$0xff]  ;;  %v2913_v0 = vld [vmem:[#allocation2 + $0x10] sm:$0xff] }
 0x671   : > { %v2923_v59 = vld [vmem:[#allocation2 + $0x60] sm:$0xff]  ;;  %v2922_v56 = vld [vmem:[#allocation2 + $0x58] sm:$0xff]  ;;  %v2921_v41 = vld [vmem:[#allocation2 + $0x50] sm:$0xff] }
 0x672   : > { %v2912_v36 = vld [vmem:[#allocation2 + $0x8] sm:$0xff]  ;;  %v2911_v33 = vld [vmem:[#allocation2] sm:$0xff] }
 0x673   : > { %2286 = vmatpush.bf16.msra.mxu0 %v2917_v3  ;;  %v2920_v28 = vld [vmem:[#allocation2 + $0x48] sm:$0xff]  ;;  %v2919_v8 = vld [vmem:[#allocation2 + $0x40] sm:$0xff] }
 0x674   : > { %2299 = vmatpush.bf16.msra.mxu1 %v2925_v44 }
 0x677   : > { %2287 = vmatpush.bf16.msra.mxu0 %v2916_v45 }
 0x678   : > { %2300 = vmatpush.bf16.msra.mxu1 %v2924_v14 }
 0x67b   : > { %2288 = vmatpush.bf16.msra.mxu0 %v2915_v31 }
 0x67c   : > { %2301 = vmatpush.bf16.msra.mxu1 %v2923_v59 }
 0x67f   : > { %2289 = vmatpush.bf16.msra.mxu0 %v2914_v49 }
 0x680   : > { %2302 = vmatpush.bf16.msra.mxu1 %v2922_v56 }
 0x683   : > { %2290 = vmatpush.bf16.msra.mxu0 %v2913_v0 }
 0x684   : > { %2303 = vmatpush.bf16.msra.mxu1 %v2921_v41 }
 0x687   : > { %2291 = vmatpush.bf16.msra.mxu0 %v2912_v36 }
 0x688   : > { %2304 = vmatpush.bf16.msra.mxu1 %v2920_v28 }
 0x68b   : > { %2292 = vmatpush.bf16.msra.mxu0 %v2911_v33 }
 0x68c   : > { %2305 = vmatpush.bf16.msra.mxu1 %v2919_v8 }
 0x68e   : > { %2293 = vmatmul.bf16.vlgmr.msra.gmra.mxu0 %v2185_v39 }
 0x68f   : > { %2306 = vmatmul.bf16.vlgmr.msra.gmra.mxu1 %v2186_v40 }
 0x70b   : > { %v2294_v61 = vpop.f32.mrf.mxu0 }
 0x70c   : > { %v2307_v6 = vpop.f32.mrf.mxu1 }
 0x70d   : > { %v2308_v18 = vadd.f32 %v2307_v6, %v2294_v61 }
 0x70f   : > { %2311 = vst [vmem:[#allocation19] sm:$0xff] %v2308_v18 }
 0x713   : > { %v2296_v26 = vpop.f32.mrf.mxu0 }
 0x714   : > { %v2309_v2 = vpop.f32.mrf.mxu1 }
 0x715 PF: > { %s4740_s18 = sld [smem:[#allocation31_spill]]  ;;  %s3817_s6 = smov [#allocation19]  }
 0x716   : > { %s4741_s5 = sld [smem:[#allocation47_spill]]  ;;  %s2318_s12 = sshll.u32 %s3817_s6, 4  ;;  %s2319_s12 = int_to_ptr.vmem [resolvable:$true] %s2318_s12 }
 0x71b   : > { %p3324_p5 = scmp.eq.s32.totalorder %s4740_s18, 9 }
 0x71c   : > { %s2320_s19 = sshll.u32 %s4741_s5, 4  ;;  %s2321_s19 = int_to_ptr.hbm [resolvable:$true] %s2320_s19 }
 0x71d   : > { %3290 = dma.vmem_to_hbm [thread:$0]  (%p3324_p5), %s2319_s12, 128, %s2321_s19, [#allocation7]  }
 0x71e   : > { %3762 = dma.done.wait (%p3324_p5), [#allocation7], 128  }
 0x71f   : > { %3764 = vsyncadd (%p3324_p5), [#allocation7], 4294967168 }
 0x720 PF: > { %s36_s13 = sadd.s32 1, %s3807_s13   ;;  %s4742_s21 = sld [smem:[#allocation26_spill]] }
 0x721   : > { %p33_p6 = scmp.ge.s32.totalorder %s36_s13, 12   ;;  %s4743_s24 = sld [smem:[#allocation27_spill]] }
 0x722   : > { %s4744_s8 = sld [smem:[#allocation36_spill]]  ;;  %s4748_s22 = smov %s3775_s23 }
 0x723   : > { %s4745_s27 = sld [smem:[#allocation30_spill]]  ;;  %s4749_s23 = smov %s4065_s11 }
 0x724   : > { %s4746_s29 = sld [smem:[#allocation34_spill]]  ;;  %s4750_s25 = smov %s3787_s26 }
 0x725   : > { %s4747_s14 = sld [smem:[#allocation35_spill]]  ;;  %s4752_s28 = smov %s3803_s30 }
 0x727   :  { %35 = sbr.rel (!%p33_p6) target bundleno = 27 (0x1b), region = 204 }
 0x728   : > { %s4751_s26 = smov %s4744_s8 }
 0x72b   : > { %s4753_s30 = smov %s4747_s14 }
 0x72c   :  { %2334 = vsyncpa [#allocation6], 1 }
 0x72d   :  { %2336 = vsyncpa [#allocation6 + $0x1], 1 }
 0x72e   :  { %2337 = vsyncpa [#allocation9], 1 }
 0x72f   :  { %2338 = vsyncpa [#allocation12], 1 }
 0x730   :  { %2340 = vsyncpa [#allocation12 + $0x1], 1 }
 0x731   :  { %2341 = vsyncpa [#allocation15], 1 }
 0x732   :  { %2343 = vsyncpa [#allocation15 + $0x1], 1 }
 0x733   :  { %2344 = vsyncpa [#allocation18], 1 }
 0x734   :  { %2346 = vsyncpa [#allocation18 + $0x1], 1 }
 0x735   :  { %2347 = vsyncpa [#allocation7], 1 }
 0x736   :  { %2349 = vsyncpa [#allocation7 + $0x1], 1 }

</bundles_post_ra>
